<compile_context>
chip_gen: v7x
topology: tpu7x:2x2x1
jax: 0.10.0
libtpu: 0.0.40
codegen_flags: <defaults>
</compile_context>

<pallas_src>
import functools

import jax
import jax.numpy as jnp
from jax.experimental import pallas as pl
from jax.experimental.pallas import tpu as pltpu

LANE = 128          # TPU lane width; all channel-ish dims are padded to this
C1, C2 = 6, 10      # real channel counts of conv1 / conv2
FLAT = 250          # flatten size (10 * 5 * 5), as in the PyTorch module


def _round_up(x, m):
    return (x + m - 1) // m * m


# ---------------------------------------------------------------------------
# Pallas kernels
# ---------------------------------------------------------------------------
def _mm_bias_kernel(a_ref, w_ref, b_ref, o_ref, *, relu):
    """Fused (tm, K) @ (K, 128) + bias (+ ReLU).

    K fits in a single tile for every layer of this network, so there is no
    reduction grid axis, no accumulator scratch, and a single o_ref store.
    bf16 operands, f32 accumulation on the MXU.
    """
    y = jnp.dot(a_ref[...], w_ref[...], preferred_element_type=jnp.float32)
    y = y + b_ref[...]
    if relu:
        y = jnp.maximum(y, 0.0)
    o_ref[...] = y


def _maxpool4_kernel(a_ref, b_ref, c_ref, d_ref, o_ref):
    """Elementwise max over the 4 taps of a 2x2 / stride-2 pooling window."""
    o_ref[...] = jnp.maximum(jnp.maximum(a_ref[...], b_ref[...]),
                             jnp.maximum(c_ref[...], d_ref[...]))


def _mlp_kernel(x_ref, w1_ref, b1_ref, w2_ref, b2_ref, o_ref):
    """Entire classifier head in one kernel: Linear -> ReLU -> Linear (+bias)."""
    h = jnp.dot(x_ref[...], w1_ref[...], preferred_element_type=jnp.float32)
    h = jnp.maximum(h + b1_ref[...], 0.0)
    y = jnp.dot(h.astype(jnp.bfloat16), w2_ref[...],
                preferred_element_type=jnp.float32)
    o_ref[...] = y + b2_ref[...]


# ---------------------------------------------------------------------------
# Kernel wrappers
# ---------------------------------------------------------------------------
def matmul_bias_act(a, w_p, bias_p, *, relu, tm_cap=512):
    """a: (M, K) f32 (unpadded); w_p: (Kp, 128) bf16 pre-padded; bias_p: (1, 128) f32.

    Returns the padded (Mp, 128) f32 result; callers slice off the pad rows.
    M is tiled (<= tm_cap rows per block) with a 'parallel' grid axis.
    """
    M, K = a.shape
    Kp, Np = w_p.shape
    Mp8 = _round_up(M, 8)
    tm = Mp8 if Mp8 <= tm_cap else tm_cap
    Mp = _round_up(Mp8, tm)
    a_p = jnp.pad(a, ((0, Mp - M), (0, Kp - K))).astype(jnp.bfloat16)

    return pl.pallas_call(
        functools.partial(_mm_bias_kernel, relu=relu),
        out_shape=jax.ShapeDtypeStruct((Mp, Np), jnp.float32),
        grid_spec=pltpu.PrefetchScalarGridSpec(
            num_scalar_prefetch=0,
            grid=(Mp // tm,),
            in_specs=[pl.BlockSpec((tm, Kp), lambda i: (i, 0)),
                      pl.BlockSpec((Kp, Np), lambda i: (0, 0)),
                      pl.BlockSpec((1, Np), lambda i: (0, 0))],
            out_specs=pl.BlockSpec((tm, Np), lambda i: (i, 0))),
        compiler_params=pltpu.CompilerParams(
            dimension_semantics=("parallel",)),
    )(a_p, w_p, bias_p)


def conv2d_bias_relu(x, w_p, bias_p, ksize):
    """VALID conv (stride 1) + bias + ReLU.  x: (N, H, W, Cin) with real channels.

    w_p is the pre-flattened (kh*kw*Cin -> padded Kp, 128) bf16 im2col weight.
    Returns (N, Ho, Wo, 128) with output channels zero-padded to the lane width.
    """
    N, H, W, C = x.shape
    kh = kw = ksize
    Ho, Wo = H - kh + 1, W - kw + 1
    taps = [x[:, dy:dy + Ho, dx:dx + Wo, :]
            for dy in range(kh) for dx in range(kw)]
    patches = jnp.concatenate(taps, axis=-1).reshape(N * Ho * Wo, kh * kw * C)
    out = matmul_bias_act(patches, w_p, bias_p, relu=True)
    return out[:N * Ho * Wo].reshape(N, Ho, Wo, out.shape[1])


def maxpool_2x2(x):
    """MaxPool2d(2, 2) on an NHWC tensor (channels already lane-padded)."""
    N, H, W, C = x.shape
    Ho, Wo = H // 2, W // 2
    views = [x[:, dy::2, dx::2, :].reshape(N * Ho * Wo, C)
             for dy in (0, 1) for dx in (0, 1)]
    out = pl.pallas_call(
        _maxpool4_kernel,
        out_shape=jax.ShapeDtypeStruct((N * Ho * Wo, C), x.dtype),
    )(*views)
    return out.reshape(N, Ho, Wo, C)


def mlp_head(x_flat, w1_p, b1_p, w2_p, b2_p):
    """x_flat: (N, 250) -> logits (N, 10) via a single fused Pallas kernel."""
    N, F = x_flat.shape
    Kp = w1_p.shape[0]
    Mp = _round_up(N, 8)
    x_p = jnp.pad(x_flat, ((0, Mp - N), (0, Kp - F))).astype(jnp.bfloat16)
    out = pl.pallas_call(
        _mlp_kernel,
        out_shape=jax.ShapeDtypeStruct((Mp, w2_p.shape[1]), jnp.float32),
    )(x_p, w1_p, b1_p, w2_p, b2_p)
    return out[:N, :10]


# ---------------------------------------------------------------------------
# Parameter initialization (deterministic, synthetic; pre-padded + pre-cast)
# ---------------------------------------------------------------------------
def _pad2(a, rows, cols):
    return jnp.pad(a, ((0, rows - a.shape[0]), (0, cols - a.shape[1])))


def init_params(key):
    ks = jax.random.split(key, 8)

    def conv_w(k, ksz, cin, cout):
        fan_in = ksz * ksz * cin
        w = jax.random.normal(k, (fan_in, cout), jnp.float32) / (fan_in ** 0.5)
        return _pad2(w, _round_up(fan_in, LANE), LANE).astype(jnp.bfloat16)

    def lin_w(k, fin, fout):
        w = jax.random.normal(k, (fin, fout), jnp.float32) / (fin ** 0.5)
        return _pad2(w, _round_up(fin, LANE), LANE).astype(jnp.bfloat16)

    def bias(k, cout):
        b = 0.05 * jax.random.normal(k, (1, cout), jnp.float32)
        return _pad2(b, 1, LANE)

    return {
        'conv1_w': conv_w(ks[0], 5, 3, C1),     # (128, 128) bf16
        'conv1_b': bias(ks[1], C1),             # (1, 128)  f32
        'conv2_w': conv_w(ks[2], 5, C1, C2),    # (256, 128) bf16
        'conv2_b': bias(ks[3], C2),
        'fc1_w': lin_w(ks[4], FLAT, 50),        # (256, 128) bf16
        'fc1_b': bias(ks[5], 50),
        'fc2_w': lin_w(ks[6], 50, 10),          # (128, 128) bf16
        'fc2_b': bias(ks[7], 10),
    }


# ---------------------------------------------------------------------------
# Forward pass (matches ClassifierCNN.forward)
# ---------------------------------------------------------------------------
def classifier_cnn_forward(params, x_nchw):
    # NCHW (PyTorch) -> NHWC (kernel layout)
    x = jnp.transpose(x_nchw, (0, 2, 3, 1)).astype(jnp.float32)

    # conv1 (5x5) + bias + ReLU fused, then 2x2 max pool
    out = conv2d_bias_relu(x, params['conv1_w'], params['conv1_b'], 5)   # (N,28,28,128)
    out = maxpool_2x2(out)                                               # (N,14,14,128)

    # conv2 consumes only the 6 real channels of the lane-padded activation
    out = conv2d_bias_relu(out[..., :C1],
                           params['conv2_w'], params['conv2_b'], 5)      # (N,10,10,128)
    out = maxpool_2x2(out)                                               # (N, 5, 5,128)

    # Flatten in PyTorch NCHW order:  (N, C, H, W) -> (N, 250)
    N = out.shape[0]
    feat = jnp.transpose(out[..., :C2], (0, 3, 1, 2)).reshape(N, FLAT)

    # Classifier head: Linear(250,50) -> ReLU -> Linear(50,10), one fused kernel
    return mlp_head(feat, params['fc1_w'], params['fc1_b'],
                    params['fc2_w'], params['fc2_b'])


if __name__ == "__main__":
    key = jax.random.PRNGKey(0)
    pkey, xkey = jax.random.split(key)
    params = init_params(pkey)
    # CIFAR-10-shaped input, NCHW as PyTorch would see it (32x32 is required
    # by the module's hard-coded flatten_size of 250).
    x = jax.random.normal(xkey, (2, 3, 32, 32), jnp.float32)

    fwd = jax.jit(classifier_cnn_forward)
    logits = fwd(params, x)
    jax.block_until_ready(logits)
    assert logits.shape == (2, 10), logits.shape
    print("KERNEL_OK")
</pallas_src>

<mosaic_0001>
module attributes {stable_mosaic.version = 11 : i64} {
  func.func @_mm_bias_kernel(%arg0: i32, %arg1: memref<512x128xbf16, #tpu.memory_space<vmem>>, %arg2: memref<128x128xbf16, #tpu.memory_space<vmem>>, %arg3: memref<1x128xf32, #tpu.memory_space<vmem>>, %arg4: memref<512x128xf32, #tpu.memory_space<vmem>>) attributes {dimension_semantics = [#tpu.dimension_semantics<parallel>], iteration_bounds = array<i64: 4>, scalar_prefetch = 0 : i64, scratch_operands = 0 : i64, tpu.core_type = #tpu.core_type<tc>, window_params = [{transform_indices = @transform_0, window_bounds = array<i64: 512, 128>}, {pipeline_mode = #tpu.pipeline_mode<synchronous>, transform_indices = @transform_1, window_bounds = array<i64: 128, 128>}, {pipeline_mode = #tpu.pipeline_mode<synchronous>, transform_indices = @transform_2, window_bounds = array<i64: 1, 128>}, {transform_indices = @transform_3, window_bounds = array<i64: 512, 128>}]} {
    %c0 = arith.constant 0 : index
    %c0_0 = arith.constant 0 : index
    %0 = vector.load %arg1[%c0, %c0_0] : memref<512x128xbf16, #tpu.memory_space<vmem>>, vector<512x128xbf16>
    %c0_1 = arith.constant 0 : index
    %c0_2 = arith.constant 0 : index
    %1 = vector.load %arg2[%c0_1, %c0_2] : memref<128x128xbf16, #tpu.memory_space<vmem>>, vector<128x128xbf16>
    %cst = arith.constant dense<0.000000e+00> : vector<512x128xf32>
    %2 = tpu.matmul %0, %1, %cst {dimension_numbers = #tpu.dot_dimension_numbers<[1], [0], [0], [1], [0, 0, 1, 1], [], []>} : vector<512x128xbf16>, vector<128x128xbf16>, vector<512x128xf32> -> vector<512x128xf32>
    %c0_3 = arith.constant 0 : index
    %c0_4 = arith.constant 0 : index
    %3 = vector.load %arg3[%c0_3, %c0_4] : memref<1x128xf32, #tpu.memory_space<vmem>>, vector<1x128xf32>
    %4 = vector.broadcast %3 : vector<1x128xf32> to vector<512x128xf32>
    %5 = arith.addf %2, %4 : vector<512x128xf32>
    %cst_5 = arith.constant 0.000000e+00 : f32
    %6 = vector.broadcast %cst_5 : f32 to vector<512x128xf32>
    %7 = arith.maximumf %5, %6 : vector<512x128xf32>
    %c0_6 = arith.constant 0 : index
    %c0_7 = arith.constant 0 : index
    %8 = vector.load %arg4[%c0_6, %c0_7] : memref<512x128xf32, #tpu.memory_space<vmem>>, vector<512x128xf32>
    tpu.vector_store %arg4[%c0_6, %c0_7], %7 {strides = array<i32>} : memref<512x128xf32, #tpu.memory_space<vmem>>, vector<512x128xf32>,
    return
  }
  func.func @transform_0(%arg0: i32) -> (i32, i32) {
    %c0_i32 = arith.constant 0 : i32
    %c0_i32_0 = arith.constant 0 : i32
    return %arg0, %c0_i32 : i32, i32
  }
  func.func @transform_1(%arg0: i32) -> (i32, i32) {
    %c0_i32 = arith.constant 0 : i32
    %c0_i32_0 = arith.constant 0 : i32
    %c0_i32_1 = arith.constant 0 : i32
    return %c0_i32, %c0_i32_0 : i32, i32
  }
  func.func @transform_2(%arg0: i32) -> (i32, i32) {
    %c0_i32 = arith.constant 0 : i32
    %c0_i32_0 = arith.constant 0 : i32
    %c0_i32_1 = arith.constant 0 : i32
    return %c0_i32, %c0_i32_0 : i32, i32
  }
  func.func @transform_3(%arg0: i32) -> (i32, i32) {
    %c0_i32 = arith.constant 0 : i32
    %c0_i32_0 = arith.constant 0 : i32
    return %arg0, %c0_i32 : i32, i32
  }
}

module attributes {stable_mosaic.version = 11 : i64} {
  func.func @_maxpool4_kernel(%arg0: memref<392x128xf32, #tpu.memory_space<vmem>>, %arg1: memref<392x128xf32, #tpu.memory_space<vmem>>, %arg2: memref<392x128xf32, #tpu.memory_space<vmem>>, %arg3: memref<392x128xf32, #tpu.memory_space<vmem>>, %arg4: memref<392x128xf32, #tpu.memory_space<vmem>>) attributes {dimension_semantics = [], scalar_prefetch = 0 : i64, scratch_operands = 0 : i64, tpu.core_type = #tpu.core_type<tc>} {
    %c0 = arith.constant 0 : index
    %c0_0 = arith.constant 0 : index
    %0 = vector.load %arg0[%c0, %c0_0] : memref<392x128xf32, #tpu.memory_space<vmem>>, vector<392x128xf32>
    %c0_1 = arith.constant 0 : index
    %c0_2 = arith.constant 0 : index
    %1 = vector.load %arg1[%c0_1, %c0_2] : memref<392x128xf32, #tpu.memory_space<vmem>>, vector<392x128xf32>
    %2 = arith.maximumf %0, %1 : vector<392x128xf32>
    %c0_3 = arith.constant 0 : index
    %c0_4 = arith.constant 0 : index
    %3 = vector.load %arg2[%c0_3, %c0_4] : memref<392x128xf32, #tpu.memory_space<vmem>>, vector<392x128xf32>
    %c0_5 = arith.constant 0 : index
    %c0_6 = arith.constant 0 : index
    %4 = vector.load %arg3[%c0_5, %c0_6] : memref<392x128xf32, #tpu.memory_space<vmem>>, vector<392x128xf32>
    %5 = arith.maximumf %3, %4 : vector<392x128xf32>
    %6 = arith.maximumf %2, %5 : vector<392x128xf32>
    %c0_7 = arith.constant 0 : index
    %c0_8 = arith.constant 0 : index
    %7 = vector.load %arg4[%c0_7, %c0_8] : memref<392x128xf32, #tpu.memory_space<vmem>>, vector<392x128xf32>
    tpu.vector_store %arg4[%c0_7, %c0_8], %6 {strides = array<i32>} : memref<392x128xf32, #tpu.memory_space<vmem>>, vector<392x128xf32>,
    return
  }
}

module attributes {stable_mosaic.version = 11 : i64} {
  func.func @_mm_bias_kernel(%arg0: i32, %arg1: memref<200x256xbf16, #tpu.memory_space<vmem>>, %arg2: memref<256x128xbf16, #tpu.memory_space<vmem>>, %arg3: memref<1x128xf32, #tpu.memory_space<vmem>>, %arg4: memref<200x128xf32, #tpu.memory_space<vmem>>) attributes {dimension_semantics = [#tpu.dimension_semantics<parallel>], iteration_bounds = array<i64: 1>, scalar_prefetch = 0 : i64, scratch_operands = 0 : i64, tpu.core_type = #tpu.core_type<tc>, window_params = [{transform_indices = @transform_0, window_bounds = array<i64: 200, 256>}, {pipeline_mode = #tpu.pipeline_mode<synchronous>, transform_indices = @transform_1, window_bounds = array<i64: 256, 128>}, {pipeline_mode = #tpu.pipeline_mode<synchronous>, transform_indices = @transform_2, window_bounds = array<i64: 1, 128>}, {transform_indices = @transform_3, window_bounds = array<i64: 200, 128>}]} {
    %c0 = arith.constant 0 : index
    %c0_0 = arith.constant 0 : index
    %0 = vector.load %arg1[%c0, %c0_0] : memref<200x256xbf16, #tpu.memory_space<vmem>>, vector<200x256xbf16>
    %c0_1 = arith.constant 0 : index
    %c0_2 = arith.constant 0 : index
    %1 = vector.load %arg2[%c0_1, %c0_2] : memref<256x128xbf16, #tpu.memory_space<vmem>>, vector<256x128xbf16>
    %cst = arith.constant dense<0.000000e+00> : vector<200x128xf32>
    %2 = tpu.matmul %0, %1, %cst {dimension_numbers = #tpu.dot_dimension_numbers<[1], [0], [0], [1], [0, 0, 1, 1], [], []>} : vector<200x256xbf16>, vector<256x128xbf16>, vector<200x128xf32> -> vector<200x128xf32>
    %c0_3 = arith.constant 0 : index
    %c0_4 = arith.constant 0 : index
    %3 = vector.load %arg3[%c0_3, %c0_4] : memref<1x128xf32, #tpu.memory_space<vmem>>, vector<1x128xf32>
    %4 = vector.broadcast %3 : vector<1x128xf32> to vector<200x128xf32>
    %5 = arith.addf %2, %4 : vector<200x128xf32>
    %cst_5 = arith.constant 0.000000e+00 : f32
    %6 = vector.broadcast %cst_5 : f32 to vector<200x128xf32>
    %7 = arith.maximumf %5, %6 : vector<200x128xf32>
    %c0_6 = arith.constant 0 : index
    %c0_7 = arith.constant 0 : index
    %8 = vector.load %arg4[%c0_6, %c0_7] : memref<200x128xf32, #tpu.memory_space<vmem>>, vector<200x128xf32>
    tpu.vector_store %arg4[%c0_6, %c0_7], %7 {strides = array<i32>} : memref<200x128xf32, #tpu.memory_space<vmem>>, vector<200x128xf32>,
    return
  }
  func.func @transform_0(%arg0: i32) -> (i32, i32) {
    %c0_i32 = arith.constant 0 : i32
    %c0_i32_0 = arith.constant 0 : i32
    return %arg0, %c0_i32 : i32, i32
  }
  func.func @transform_1(%arg0: i32) -> (i32, i32) {
    %c0_i32 = arith.constant 0 : i32
    %c0_i32_0 = arith.constant 0 : i32
    %c0_i32_1 = arith.constant 0 : i32
    return %c0_i32, %c0_i32_0 : i32, i32
  }
  func.func @transform_2(%arg0: i32) -> (i32, i32) {
    %c0_i32 = arith.constant 0 : i32
    %c0_i32_0 = arith.constant 0 : i32
    %c0_i32_1 = arith.constant 0 : i32
    return %c0_i32, %c0_i32_0 : i32, i32
  }
  func.func @transform_3(%arg0: i32) -> (i32, i32) {
    %c0_i32 = arith.constant 0 : i32
    %c0_i32_0 = arith.constant 0 : i32
    return %arg0, %c0_i32 : i32, i32
  }
}

module attributes {stable_mosaic.version = 11 : i64} {
  func.func @_maxpool4_kernel(%arg0: memref<50x128xf32, #tpu.memory_space<vmem>>, %arg1: memref<50x128xf32, #tpu.memory_space<vmem>>, %arg2: memref<50x128xf32, #tpu.memory_space<vmem>>, %arg3: memref<50x128xf32, #tpu.memory_space<vmem>>, %arg4: memref<50x128xf32, #tpu.memory_space<vmem>>) attributes {dimension_semantics = [], scalar_prefetch = 0 : i64, scratch_operands = 0 : i64, tpu.core_type = #tpu.core_type<tc>} {
    %c0 = arith.constant 0 : index
    %c0_0 = arith.constant 0 : index
    %0 = vector.load %arg0[%c0, %c0_0] : memref<50x128xf32, #tpu.memory_space<vmem>>, vector<50x128xf32>
    %c0_1 = arith.constant 0 : index
    %c0_2 = arith.constant 0 : index
    %1 = vector.load %arg1[%c0_1, %c0_2] : memref<50x128xf32, #tpu.memory_space<vmem>>, vector<50x128xf32>
    %2 = arith.maximumf %0, %1 : vector<50x128xf32>
    %c0_3 = arith.constant 0 : index
    %c0_4 = arith.constant 0 : index
    %3 = vector.load %arg2[%c0_3, %c0_4] : memref<50x128xf32, #tpu.memory_space<vmem>>, vector<50x128xf32>
    %c0_5 = arith.constant 0 : index
    %c0_6 = arith.constant 0 : index
    %4 = vector.load %arg3[%c0_5, %c0_6] : memref<50x128xf32, #tpu.memory_space<vmem>>, vector<50x128xf32>
    %5 = arith.maximumf %3, %4 : vector<50x128xf32>
    %6 = arith.maximumf %2, %5 : vector<50x128xf32>
    %c0_7 = arith.constant 0 : index
    %c0_8 = arith.constant 0 : index
    %7 = vector.load %arg4[%c0_7, %c0_8] : memref<50x128xf32, #tpu.memory_space<vmem>>, vector<50x128xf32>
    tpu.vector_store %arg4[%c0_7, %c0_8], %6 {strides = array<i32>} : memref<50x128xf32, #tpu.memory_space<vmem>>, vector<50x128xf32>,
    return
  }
}

module attributes {stable_mosaic.version = 11 : i64} {
  func.func @_mlp_kernel(%arg0: memref<8x256xbf16, #tpu.memory_space<vmem>>, %arg1: memref<256x128xbf16, #tpu.memory_space<vmem>>, %arg2: memref<1x128xf32, #tpu.memory_space<vmem>>, %arg3: memref<128x128xbf16, #tpu.memory_space<vmem>>, %arg4: memref<1x128xf32, #tpu.memory_space<vmem>>, %arg5: memref<8x128xf32, #tpu.memory_space<vmem>>) attributes {dimension_semantics = [], scalar_prefetch = 0 : i64, scratch_operands = 0 : i64, tpu.core_type = #tpu.core_type<tc>} {
    %c0 = arith.constant 0 : index
    %c0_0 = arith.constant 0 : index
    %0 = vector.load %arg0[%c0, %c0_0] : memref<8x256xbf16, #tpu.memory_space<vmem>>, vector<8x256xbf16>
    %c0_1 = arith.constant 0 : index
    %c0_2 = arith.constant 0 : index
    %1 = vector.load %arg1[%c0_1, %c0_2] : memref<256x128xbf16, #tpu.memory_space<vmem>>, vector<256x128xbf16>
    %cst = arith.constant dense<0.000000e+00> : vector<8x128xf32>
    %2 = tpu.matmul %0, %1, %cst {dimension_numbers = #tpu.dot_dimension_numbers<[1], [0], [0], [1], [0, 0, 1, 1], [], []>} : vector<8x256xbf16>, vector<256x128xbf16>, vector<8x128xf32> -> vector<8x128xf32>
    %c0_3 = arith.constant 0 : index
    %c0_4 = arith.constant 0 : index
    %3 = vector.load %arg2[%c0_3, %c0_4] : memref<1x128xf32, #tpu.memory_space<vmem>>, vector<1x128xf32>
    %4 = vector.broadcast %3 : vector<1x128xf32> to vector<8x128xf32>
    %5 = arith.addf %2, %4 : vector<8x128xf32>
    %cst_5 = arith.constant 0.000000e+00 : f32
    %6 = vector.broadcast %cst_5 : f32 to vector<8x128xf32>
    %7 = arith.maximumf %5, %6 : vector<8x128xf32>
    %8 = arith.truncf %7 : vector<8x128xf32> to vector<8x128xbf16>
    %c0_6 = arith.constant 0 : index
    %c0_7 = arith.constant 0 : index
    %9 = vector.load %arg3[%c0_6, %c0_7] : memref<128x128xbf16, #tpu.memory_space<vmem>>, vector<128x128xbf16>
    %cst_8 = arith.constant dense<0.000000e+00> : vector<8x128xf32>
    %10 = tpu.matmul %8, %9, %cst_8 {dimension_numbers = #tpu.dot_dimension_numbers<[1], [0], [0], [1], [0, 0, 1, 1], [], []>} : vector<8x128xbf16>, vector<128x128xbf16>, vector<8x128xf32> -> vector<8x128xf32>
    %c0_9 = arith.constant 0 : index
    %c0_10 = arith.constant 0 : index
    %11 = vector.load %arg4[%c0_9, %c0_10] : memref<1x128xf32, #tpu.memory_space<vmem>>, vector<1x128xf32>
    %12 = vector.broadcast %11 : vector<1x128xf32> to vector<8x128xf32>
    %13 = arith.addf %10, %12 : vector<8x128xf32>
    %c0_11 = arith.constant 0 : index
    %c0_12 = arith.constant 0 : index
    %14 = vector.load %arg5[%c0_11, %c0_12] : memref<8x128xf32, #tpu.memory_space<vmem>>, vector<8x128xf32>
    tpu.vector_store %arg5[%c0_11, %c0_12], %13 {strides = array<i32>} : memref<8x128xf32, #tpu.memory_space<vmem>>, vector<8x128xf32>,
    return
  }
}

</mosaic_0001>

<bundles_post_ra>
// kernel: classifier_cnn_forward.5
= control target key start
LH: loop header
LB: loop body
LE: loop exit
PB: predicated region body
PF: predicated region fallthrough
CT: control target
= control target key end

     0   :  { %s1239_s12 = smov 0   ;;  %s1453_s0 = inlined_call_operand.vmem [shape: bf16[2048,128], index: 0, kind: input, shape index: {}]   ;;  %s1454_s1 = inlined_call_operand.vmem [shape: bf16[128,128], index: 1, kind: input, shape index: {}]   ;;  %s1455_s2 = inlined_call_operand.vmem [shape: f32[1,128], index: 2, kind: input, shape index: {}]   ;;  %s1456_s3 = inlined_call_operand.vmem [shape: f32[2048,128], index: 3, kind: output, shape index: {}]  }
   0x1 LB: > { %s975_s13 = sadd.s32 4294967295, %s1217_s12   ;;  %p979_p0 = scmp.ge.s32.totalorder %s1217_s12, 1  ;;  %s1217_s12 = sphi %s1239_s12, %s13_s12  }
   0x2   : > { %p138_p1 = scmp.lt.s32.totalorder %s1217_s12, 5 }
   0x4   : > { %p139_p2 = pnand %p979_p0, %p138_p1 }
   0x5   : > { %v1171_v0 = vld [vmem:[%s1454_s1] sm:$0xff] (!%p139_p2)   ;;  %s980_s16 = sshll.u32 (!%p139_p2), %s975_s13, 6  ;;  %v1172_v1 = vld [vmem:[%s1454_s1 + $0x8] sm:$0xff] (!%p139_p2)   ;;  %v1173_v2 = vld [vmem:[%s1454_s1 + $0x10] sm:$0xff] (!%p139_p2)  }
   0x6   : > { %142 = sbr.rel (%p139_p2) target bundleno = 314 (0x13a), region = 32  ;;  %p163_p3 = scmp.lt.s32.totalorder (!%p139_p2), %s980_s16, 255  ;;  %1067 = vmatprep.subr.bf16.mxu0 (!%p139_p2), %v1171_v0  ;;  %1147 = vmatprep.subr.bf16.mxu1 (!%p139_p2), %v1171_v0  ;;  %v1174_v3 = vld [vmem:[%s1454_s1 + $0x18] sm:$0xff] (!%p139_p2)   ;;  %v1175_v6 = vld [vmem:[%s1454_s1 + $0x20] sm:$0xff] (!%p139_p2)   ;;  %v1176_v7 = vld [vmem:[%s1454_s1 + $0x28] sm:$0xff] (!%p139_p2)  }
   0x7   : > { %1068 = vmatpush3.bf16.msra.mxu0 (!%p139_p2), %v1171_v0  ;;  %1155 = vmatpush3.bf16.msra.mxu1 (!%p139_p2), %v1171_v0  ;;  %v1177_v8 = vld [vmem:[%s1454_s1 + $0x30] sm:$0xff] (!%p139_p2)   ;;  %v1178_v9 = vld [vmem:[%s1454_s1 + $0x38] sm:$0xff] (!%p139_p2)   ;;  %v1314_v40 = vld [vmem:[%s1455_s2] ss:$0 sm:$0xff] (!%p139_p2) }
   0x8   : > { %1069 = vmatprep.subr.bf16.mxu0 (!%p139_p2), %v1172_v1  ;;  %1148 = vmatprep.subr.bf16.mxu1 (!%p139_p2), %v1172_v1 }
   0xb   : > { %1070 = vmatpush3.bf16.msra.mxu0 (!%p139_p2), %v1172_v1  ;;  %1156 = vmatpush3.bf16.msra.mxu1 (!%p139_p2), %v1172_v1 }
   0xc   : > { %1071 = vmatprep.subr.bf16.mxu0 (!%p139_p2), %v1173_v2  ;;  %1149 = vmatprep.subr.bf16.mxu1 (!%p139_p2), %v1173_v2 }
   0xd   : > { %s1458_s16 = smov (!%p163_p3, %s980_s16), 255 }
   0xe   : > { %s981_s21 = sshll.u32 %s1458_s16, 2  ;;  %s983_s10 = sshll.u32 %s1458_s16, 3 }
   0xf   : > { %s1262_s24 = scalar_lea.vmem %s1453_s0, %s981_s21  ;;  %1072 = vmatpush3.bf16.msra.mxu0 %v1173_v2  ;;  %1157 = vmatpush3.bf16.msra.mxu1 %v1173_v2  ;;  %s1322_s14 = scalar_lea.vmem %s1456_s3, %s983_s10 }
  0x10   : > { %v1179_v4 = vld [vmem:[%s1262_s24] sm:$0xff]   ;;  %1073 = vmatprep.subr.bf16.mxu0 %v1174_v3  ;;  %1150 = vmatprep.subr.bf16.mxu1 %v1174_v3  ;;  %v1181_v10 = vld [vmem:[%s1262_s24 + $0x8] sm:$0xff]   ;;  %v1183_v12 = vld [vmem:[%s1262_s24 + $0x10] sm:$0xff]  }
  0x11   : > { %v1180_v5 = vld [vmem:[%s1262_s24 + $0x80] sm:$0xff]   ;;  %1083 = vmatprep.mubr.bf16.mxu0 %v1179_v4  ;;  %v1182_v11 = vld [vmem:[%s1262_s24 + $0x88] sm:$0xff]   ;;  %v1184_v13 = vld [vmem:[%s1262_s24 + $0x90] sm:$0xff]  }
  0x12   : > { %1115 = vmatprep.mubr.bf16.mxu1 %v1180_v5  ;;  %v1185_v14 = vld [vmem:[%s1262_s24 + $0x18] sm:$0xff]   ;;  %v1187_v16 = vld [vmem:[%s1262_s24 + $0x20] sm:$0xff]   ;;  %v1189_v18 = vld [vmem:[%s1262_s24 + $0x28] sm:$0xff]  }
  0x13   : > { %1074 = vmatpush3.bf16.msra.mxu0 %v1174_v3  ;;  %1158 = vmatpush3.bf16.msra.mxu1 %v1174_v3  ;;  %v1186_v15 = vld [vmem:[%s1262_s24 + $0x98] sm:$0xff]   ;;  %v1188_v17 = vld [vmem:[%s1262_s24 + $0xa0] sm:$0xff]   ;;  %v1190_v19 = vld [vmem:[%s1262_s24 + $0xa8] sm:$0xff]  }
  0x14   : > { %1075 = vmatprep.subr.bf16.mxu0 %v1175_v6  ;;  %1151 = vmatprep.subr.bf16.mxu1 %v1175_v6  ;;  %v1191_v20 = vld [vmem:[%s1262_s24 + $0x30] sm:$0xff]   ;;  %v1193_v22 = vld [vmem:[%s1262_s24 + $0x38] sm:$0xff]   ;;  %v1195_v24 = vld [vmem:[%s1262_s24 + $0x40] sm:$0xff]  }
  0x15   : > { %v1192_v21 = vld [vmem:[%s1262_s24 + $0xb0] sm:$0xff]   ;;  %v1194_v23 = vld [vmem:[%s1262_s24 + $0xb8] sm:$0xff]   ;;  %v1196_v25 = vld [vmem:[%s1262_s24 + $0xc0] sm:$0xff]  }
  0x16   : > { %v1197_v26 = vld [vmem:[%s1262_s24 + $0x48] sm:$0xff]   ;;  %v1199_v28 = vld [vmem:[%s1262_s24 + $0x50] sm:$0xff]   ;;  %v1201_v30 = vld [vmem:[%s1262_s24 + $0x58] sm:$0xff]  }
  0x17   : > { %1076 = vmatpush3.bf16.msra.mxu0 %v1175_v6  ;;  %1159 = vmatpush3.bf16.msra.mxu1 %v1175_v6  ;;  %v1198_v27 = vld [vmem:[%s1262_s24 + $0xc8] sm:$0xff]   ;;  %v1200_v29 = vld [vmem:[%s1262_s24 + $0xd0] sm:$0xff]   ;;  %v1202_v31 = vld [vmem:[%s1262_s24 + $0xd8] sm:$0xff]  }
  0x18   : > { %1077 = vmatprep.subr.bf16.mxu0 %v1176_v7  ;;  %1152 = vmatprep.subr.bf16.mxu1 %v1176_v7  ;;  %v1203_v32 = vld [vmem:[%s1262_s24 + $0x60] sm:$0xff]   ;;  %v1205_v34 = vld [vmem:[%s1262_s24 + $0x68] sm:$0xff]   ;;  %v1207_v36 = vld [vmem:[%s1262_s24 + $0x70] sm:$0xff]  }
  0x19   : > { %v1204_v33 = vld [vmem:[%s1262_s24 + $0xe0] sm:$0xff]   ;;  %v1206_v35 = vld [vmem:[%s1262_s24 + $0xe8] sm:$0xff]   ;;  %v1208_v37 = vld [vmem:[%s1262_s24 + $0xf0] sm:$0xff]  }
  0x1a   : > { %v1209_v38 = vld [vmem:[%s1262_s24 + $0x78] sm:$0xff]  }
  0x1b   : > { %1078 = vmatpush3.bf16.msra.mxu0 %v1176_v7  ;;  %1160 = vmatpush3.bf16.msra.mxu1 %v1176_v7  ;;  %v1210_v39 = vld [vmem:[%s1262_s24 + $0xf8] sm:$0xff]  }
  0x1c   : > { %1079 = vmatprep.subr.bf16.mxu0 %v1177_v8  ;;  %1153 = vmatprep.subr.bf16.mxu1 %v1177_v8 }
  0x1f   : > { %1080 = vmatpush3.bf16.msra.mxu0 %v1177_v8  ;;  %1161 = vmatpush3.bf16.msra.mxu1 %v1177_v8 }
  0x20   : > { %1081 = vmatprep.subr.bf16.mxu0 %v1178_v9  ;;  %1154 = vmatprep.subr.bf16.mxu1 %v1178_v9 }
  0x23   : > { %1082 = vmatpush3.bf16.msra.mxu0 %v1178_v9  ;;  %1162 = vmatpush3.bf16.msra.mxu1 %v1178_v9 }
  0x26   : > { %1084 = vmatmul.mubr.bf16.vlgmr.msra.gmra.mrb[0].mxu0 %v1181_v10  ;;  %1116 = vmatmul.mubr.bf16.vlgmr.msra.gmra.mrb[0].mxu1 %v1182_v11 }
  0x27   : > { %1087 = vmatprep.mubr.bf16.mxu0 %v1183_v12  ;;  %1119 = vmatprep.mubr.bf16.mxu1 %v1184_v13 }
  0x2e   : > { %1088 = vmatmul.mubr.bf16.gmra.mrb[4].mxu0 %v1185_v14  ;;  %1120 = vmatmul.mubr.bf16.gmra.mrb[4].mxu1 %v1186_v15 }
  0x2f   : > { %1091 = vmatprep.mubr.bf16.mxu0 %v1187_v16  ;;  %1123 = vmatprep.mubr.bf16.mxu1 %v1188_v17 }
  0x36   : > { %1092 = vmatmul.mubr.bf16.gmra.mrb[8].mxu0 %v1189_v18  ;;  %1124 = vmatmul.mubr.bf16.gmra.mrb[8].mxu1 %v1190_v19 }
  0x37   : > { %1095 = vmatprep.mubr.bf16.mxu0 %v1191_v20  ;;  %1127 = vmatprep.mubr.bf16.mxu1 %v1192_v21 }
  0x3e   : > { %1096 = vmatmul.mubr.bf16.gmra.mrb[12].mxu0 %v1193_v22  ;;  %1128 = vmatmul.mubr.bf16.gmra.mrb[12].mxu1 %v1194_v23 }
  0x3f   : > { %1099 = vmatprep.mubr.bf16.mxu0 %v1195_v24  ;;  %1131 = vmatprep.mubr.bf16.mxu1 %v1196_v25 }
  0x46   : > { %1100 = vmatmul.mubr.bf16.gmra.mrb[16].mxu0 %v1197_v26  ;;  %1132 = vmatmul.mubr.bf16.gmra.mrb[16].mxu1 %v1198_v27 }
  0x47   : > { %1103 = vmatprep.mubr.bf16.mxu0 %v1199_v28  ;;  %1135 = vmatprep.mubr.bf16.mxu1 %v1200_v29 }
  0x4e   : > { %1104 = vmatmul.mubr.bf16.gmra.mrb[20].mxu0 %v1201_v30  ;;  %1136 = vmatmul.mubr.bf16.gmra.mrb[20].mxu1 %v1202_v31 }
  0x4f   : > { %1107 = vmatprep.mubr.bf16.mxu0 %v1203_v32  ;;  %1139 = vmatprep.mubr.bf16.mxu1 %v1204_v33 }
  0x56   : > { %1108 = vmatmul.mubr.bf16.gmra.mrb[24].mxu0 %v1205_v34  ;;  %1140 = vmatmul.mubr.bf16.gmra.mrb[24].mxu1 %v1206_v35 }
  0x57   : > { %1111 = vmatprep.mubr.bf16.mxu0 %v1207_v36  ;;  %1143 = vmatprep.mubr.bf16.mxu1 %v1208_v37 }
  0x5e   : > { %1112 = vmatmul.mubr.bf16.gmra.mrb[28].mxu0 %v1209_v38  ;;  %1144 = vmatmul.mubr.bf16.gmra.mrb[28].mxu1 %v1210_v39 }
  0xf9   : > { %v1085_v41 = vpop.f32.mrb[0].mxu0  ;;  %v1117_v42 = vpop.f32.mrb[0].mxu1 }
  0xfa   : > { %v545_v43 = vadd.f32 %v1085_v41, %v1314_v40  ;;  %v673_v44 = vadd.f32 %v1117_v42, %v1314_v40  ;;  %v536_v45 = vpop.f32.mrb[1].mxu0  ;;  %v664_v46 = vpop.f32.mrb[1].mxu1 }
  0xfb   : > { %v537_v47 = vadd.f32 %v1314_v40, %v536_v45  ;;  %v665_v48 = vadd.f32 %v1314_v40, %v664_v46  ;;  %v1086_v49 = vpop.f32.mrb[2].mxu0  ;;  %v1118_v50 = vpop.f32.mrb[2].mxu1 }
  0xfc   : > { %v793_v51 = vmax.f32 %v545_v43, 0.0  ;;  %v825_v52 = vmax.f32 %v673_v44, 0.0  ;;  %v548_v53 = vadd.f32 %v1086_v49, %v1314_v40  ;;  %v676_v54 = vadd.f32 %v1118_v50, %v1314_v40  ;;  %v539_v55 = vpop.f32.mrb[3].mxu0  ;;  %v667_v56 = vpop.f32.mrb[3].mxu1 }
  0xfd   : > { %v791_v57 = vmax.f32 %v537_v47, 0.0  ;;  %v823_v58 = vmax.f32 %v665_v48, 0.0  ;;  %v540_v59 = vadd.f32 %v1314_v40, %v539_v55  ;;  %v668_v60 = vadd.f32 %v1314_v40, %v667_v56 }
  0xfe   : > { %857 = vst [vmem:[%s1322_s14 + $0x10] sm:$0xff] %v793_v51  ;;  %889 = vst [vmem:[%s1322_s14 + $0x110] sm:$0xff] %v825_v52  ;;  %v794_v61 = vmax.f32 %v548_v53, 0.0  ;;  %v826_v62 = vmax.f32 %v676_v54, 0.0 }
  0xff   : > { %855 = vst [vmem:[%s1322_s14] sm:$0xff] %v791_v57  ;;  %887 = vst [vmem:[%s1322_s14 + $0x100] sm:$0xff] %v823_v58  ;;  %v792_v63 = vmax.f32 %v540_v59, 0.0  ;;  %v824_v0 = vmax.f32 %v668_v60, 0.0 }
 0x100   : > { %858 = vst [vmem:[%s1322_s14 + $0x18] sm:$0xff] %v794_v61  ;;  %890 = vst [vmem:[%s1322_s14 + $0x118] sm:$0xff] %v826_v62 }
 0x101   : > { %856 = vst [vmem:[%s1322_s14 + $0x8] sm:$0xff] %v792_v63  ;;  %888 = vst [vmem:[%s1322_s14 + $0x108] sm:$0xff] %v824_v0  ;;  %v1089_v1 = vpop.f32.mrb[4].mxu0  ;;  %v1121_v2 = vpop.f32.mrb[4].mxu1 }
 0x102   : > { %v561_v3 = vadd.f32 %v1089_v1, %v1314_v40  ;;  %v689_v4 = vadd.f32 %v1121_v2, %v1314_v40  ;;  %v552_v5 = vpop.f32.mrb[5].mxu0  ;;  %v680_v6 = vpop.f32.mrb[5].mxu1 }
 0x103   : > { %v553_v7 = vadd.f32 %v1314_v40, %v552_v5  ;;  %v681_v8 = vadd.f32 %v1314_v40, %v680_v6  ;;  %v1090_v9 = vpop.f32.mrb[6].mxu0  ;;  %v1122_v10 = vpop.f32.mrb[6].mxu1 }
 0x104   : > { %v797_v11 = vmax.f32 %v561_v3, 0.0  ;;  %v829_v12 = vmax.f32 %v689_v4, 0.0  ;;  %v564_v13 = vadd.f32 %v1090_v9, %v1314_v40  ;;  %v692_v14 = vadd.f32 %v1122_v10, %v1314_v40  ;;  %v555_v15 = vpop.f32.mrb[7].mxu0  ;;  %v683_v16 = vpop.f32.mrb[7].mxu1 }
 0x105   : > { %v795_v17 = vmax.f32 %v553_v7, 0.0  ;;  %v827_v18 = vmax.f32 %v681_v8, 0.0  ;;  %v556_v19 = vadd.f32 %v1314_v40, %v555_v15  ;;  %v684_v20 = vadd.f32 %v1314_v40, %v683_v16 }
 0x106   : > { %861 = vst [vmem:[%s1322_s14 + $0x30] sm:$0xff] %v797_v11  ;;  %893 = vst [vmem:[%s1322_s14 + $0x130] sm:$0xff] %v829_v12  ;;  %v798_v21 = vmax.f32 %v564_v13, 0.0  ;;  %v830_v22 = vmax.f32 %v692_v14, 0.0 }
 0x107   : > { %859 = vst [vmem:[%s1322_s14 + $0x20] sm:$0xff] %v795_v17  ;;  %891 = vst [vmem:[%s1322_s14 + $0x120] sm:$0xff] %v827_v18  ;;  %v796_v23 = vmax.f32 %v556_v19, 0.0  ;;  %v828_v24 = vmax.f32 %v684_v20, 0.0 }
 0x108   : > { %862 = vst [vmem:[%s1322_s14 + $0x38] sm:$0xff] %v798_v21  ;;  %894 = vst [vmem:[%s1322_s14 + $0x138] sm:$0xff] %v830_v22 }
 0x109   : > { %860 = vst [vmem:[%s1322_s14 + $0x28] sm:$0xff] %v796_v23  ;;  %892 = vst [vmem:[%s1322_s14 + $0x128] sm:$0xff] %v828_v24  ;;  %v1093_v25 = vpop.f32.mrb[8].mxu0  ;;  %v1125_v26 = vpop.f32.mrb[8].mxu1 }
 0x10a   : > { %v577_v27 = vadd.f32 %v1093_v25, %v1314_v40  ;;  %v705_v28 = vadd.f32 %v1125_v26, %v1314_v40  ;;  %v568_v29 = vpop.f32.mrb[9].mxu0  ;;  %v696_v30 = vpop.f32.mrb[9].mxu1 }
 0x10b   : > { %v569_v31 = vadd.f32 %v1314_v40, %v568_v29  ;;  %v697_v32 = vadd.f32 %v1314_v40, %v696_v30  ;;  %v1094_v33 = vpop.f32.mrb[10].mxu0  ;;  %v1126_v34 = vpop.f32.mrb[10].mxu1 }
 0x10c   : > { %v801_v35 = vmax.f32 %v577_v27, 0.0  ;;  %v833_v36 = vmax.f32 %v705_v28, 0.0  ;;  %v580_v37 = vadd.f32 %v1094_v33, %v1314_v40  ;;  %v708_v38 = vadd.f32 %v1126_v34, %v1314_v40  ;;  %v571_v39 = vpop.f32.mrb[11].mxu0  ;;  %v699_v41 = vpop.f32.mrb[11].mxu1 }
 0x10d   : > { %v799_v42 = vmax.f32 %v569_v31, 0.0  ;;  %v831_v43 = vmax.f32 %v697_v32, 0.0  ;;  %v572_v44 = vadd.f32 %v1314_v40, %v571_v39  ;;  %v700_v45 = vadd.f32 %v1314_v40, %v699_v41 }
 0x10e   : > { %865 = vst [vmem:[%s1322_s14 + $0x50] sm:$0xff] %v801_v35  ;;  %897 = vst [vmem:[%s1322_s14 + $0x150] sm:$0xff] %v833_v36  ;;  %v802_v46 = vmax.f32 %v580_v37, 0.0  ;;  %v834_v47 = vmax.f32 %v708_v38, 0.0 }
 0x10f   : > { %863 = vst [vmem:[%s1322_s14 + $0x40] sm:$0xff] %v799_v42  ;;  %895 = vst [vmem:[%s1322_s14 + $0x140] sm:$0xff] %v831_v43  ;;  %v800_v48 = vmax.f32 %v572_v44, 0.0  ;;  %v832_v49 = vmax.f32 %v700_v45, 0.0 }
 0x110   : > { %866 = vst [vmem:[%s1322_s14 + $0x58] sm:$0xff] %v802_v46  ;;  %898 = vst [vmem:[%s1322_s14 + $0x158] sm:$0xff] %v834_v47 }
 0x111   : > { %864 = vst [vmem:[%s1322_s14 + $0x48] sm:$0xff] %v800_v48  ;;  %896 = vst [vmem:[%s1322_s14 + $0x148] sm:$0xff] %v832_v49  ;;  %v1097_v50 = vpop.f32.mrb[12].mxu0  ;;  %v1129_v51 = vpop.f32.mrb[12].mxu1 }
 0x112   : > { %v593_v52 = vadd.f32 %v1097_v50, %v1314_v40  ;;  %v721_v53 = vadd.f32 %v1129_v51, %v1314_v40  ;;  %v584_v54 = vpop.f32.mrb[13].mxu0  ;;  %v712_v55 = vpop.f32.mrb[13].mxu1 }
 0x113   : > { %v585_v56 = vadd.f32 %v1314_v40, %v584_v54  ;;  %v713_v57 = vadd.f32 %v1314_v40, %v712_v55  ;;  %v1098_v58 = vpop.f32.mrb[14].mxu0  ;;  %v1130_v59 = vpop.f32.mrb[14].mxu1 }
 0x114   : > { %v805_v60 = vmax.f32 %v593_v52, 0.0  ;;  %v837_v61 = vmax.f32 %v721_v53, 0.0  ;;  %v596_v62 = vadd.f32 %v1098_v58, %v1314_v40  ;;  %v724_v63 = vadd.f32 %v1130_v59, %v1314_v40  ;;  %v587_v0 = vpop.f32.mrb[15].mxu0  ;;  %v715_v1 = vpop.f32.mrb[15].mxu1 }
 0x115   : > { %v803_v2 = vmax.f32 %v585_v56, 0.0  ;;  %v835_v3 = vmax.f32 %v713_v57, 0.0  ;;  %v588_v4 = vadd.f32 %v1314_v40, %v587_v0  ;;  %v716_v5 = vadd.f32 %v1314_v40, %v715_v1 }
 0x116   : > { %869 = vst [vmem:[%s1322_s14 + $0x70] sm:$0xff] %v805_v60  ;;  %901 = vst [vmem:[%s1322_s14 + $0x170] sm:$0xff] %v837_v61  ;;  %v806_v6 = vmax.f32 %v596_v62, 0.0  ;;  %v838_v7 = vmax.f32 %v724_v63, 0.0 }
 0x117   : > { %867 = vst [vmem:[%s1322_s14 + $0x60] sm:$0xff] %v803_v2  ;;  %899 = vst [vmem:[%s1322_s14 + $0x160] sm:$0xff] %v835_v3  ;;  %v804_v8 = vmax.f32 %v588_v4, 0.0  ;;  %v836_v9 = vmax.f32 %v716_v5, 0.0 }
 0x118   : > { %870 = vst [vmem:[%s1322_s14 + $0x78] sm:$0xff] %v806_v6  ;;  %902 = vst [vmem:[%s1322_s14 + $0x178] sm:$0xff] %v838_v7 }
 0x119   : > { %868 = vst [vmem:[%s1322_s14 + $0x68] sm:$0xff] %v804_v8  ;;  %900 = vst [vmem:[%s1322_s14 + $0x168] sm:$0xff] %v836_v9  ;;  %v1101_v10 = vpop.f32.mrb[16].mxu0  ;;  %v1133_v11 = vpop.f32.mrb[16].mxu1 }
 0x11a   : > { %v609_v12 = vadd.f32 %v1101_v10, %v1314_v40  ;;  %v737_v13 = vadd.f32 %v1133_v11, %v1314_v40  ;;  %v600_v14 = vpop.f32.mrb[17].mxu0  ;;  %v728_v15 = vpop.f32.mrb[17].mxu1 }
 0x11b   : > { %v601_v16 = vadd.f32 %v1314_v40, %v600_v14  ;;  %v729_v17 = vadd.f32 %v1314_v40, %v728_v15  ;;  %v1102_v18 = vpop.f32.mrb[18].mxu0  ;;  %v1134_v19 = vpop.f32.mrb[18].mxu1 }
 0x11c   : > { %v809_v20 = vmax.f32 %v609_v12, 0.0  ;;  %v841_v21 = vmax.f32 %v737_v13, 0.0  ;;  %v612_v22 = vadd.f32 %v1102_v18, %v1314_v40  ;;  %v740_v23 = vadd.f32 %v1134_v19, %v1314_v40  ;;  %v603_v24 = vpop.f32.mrb[19].mxu0  ;;  %v731_v25 = vpop.f32.mrb[19].mxu1 }
 0x11d   : > { %v807_v26 = vmax.f32 %v601_v16, 0.0  ;;  %v839_v27 = vmax.f32 %v729_v17, 0.0  ;;  %v604_v28 = vadd.f32 %v1314_v40, %v603_v24  ;;  %v732_v29 = vadd.f32 %v1314_v40, %v731_v25 }
 0x11e   : > { %873 = vst [vmem:[%s1322_s14 + $0x90] sm:$0xff] %v809_v20  ;;  %905 = vst [vmem:[%s1322_s14 + $0x190] sm:$0xff] %v841_v21  ;;  %v810_v30 = vmax.f32 %v612_v22, 0.0  ;;  %v842_v31 = vmax.f32 %v740_v23, 0.0 }
 0x11f   : > { %871 = vst [vmem:[%s1322_s14 + $0x80] sm:$0xff] %v807_v26  ;;  %903 = vst [vmem:[%s1322_s14 + $0x180] sm:$0xff] %v839_v27  ;;  %v808_v32 = vmax.f32 %v604_v28, 0.0  ;;  %v840_v33 = vmax.f32 %v732_v29, 0.0 }
 0x120   : > { %874 = vst [vmem:[%s1322_s14 + $0x98] sm:$0xff] %v810_v30  ;;  %906 = vst [vmem:[%s1322_s14 + $0x198] sm:$0xff] %v842_v31 }
 0x121   : > { %872 = vst [vmem:[%s1322_s14 + $0x88] sm:$0xff] %v808_v32  ;;  %904 = vst [vmem:[%s1322_s14 + $0x188] sm:$0xff] %v840_v33  ;;  %v1105_v34 = vpop.f32.mrb[20].mxu0  ;;  %v1137_v35 = vpop.f32.mrb[20].mxu1 }
 0x122   : > { %v625_v36 = vadd.f32 %v1105_v34, %v1314_v40  ;;  %v753_v37 = vadd.f32 %v1137_v35, %v1314_v40  ;;  %v616_v38 = vpop.f32.mrb[21].mxu0  ;;  %v744_v39 = vpop.f32.mrb[21].mxu1 }
 0x123   : > { %v617_v41 = vadd.f32 %v1314_v40, %v616_v38  ;;  %v745_v42 = vadd.f32 %v1314_v40, %v744_v39  ;;  %v1106_v43 = vpop.f32.mrb[22].mxu0  ;;  %v1138_v44 = vpop.f32.mrb[22].mxu1 }
 0x124   : > { %v813_v45 = vmax.f32 %v625_v36, 0.0  ;;  %v845_v46 = vmax.f32 %v753_v37, 0.0  ;;  %v628_v47 = vadd.f32 %v1106_v43, %v1314_v40  ;;  %v756_v48 = vadd.f32 %v1138_v44, %v1314_v40  ;;  %v619_v49 = vpop.f32.mrb[23].mxu0  ;;  %v747_v50 = vpop.f32.mrb[23].mxu1 }
 0x125   : > { %v811_v51 = vmax.f32 %v617_v41, 0.0  ;;  %v843_v52 = vmax.f32 %v745_v42, 0.0  ;;  %v620_v53 = vadd.f32 %v1314_v40, %v619_v49  ;;  %v748_v54 = vadd.f32 %v1314_v40, %v747_v50 }
 0x126   : > { %877 = vst [vmem:[%s1322_s14 + $0xb0] sm:$0xff] %v813_v45  ;;  %909 = vst [vmem:[%s1322_s14 + $0x1b0] sm:$0xff] %v845_v46  ;;  %v814_v55 = vmax.f32 %v628_v47, 0.0  ;;  %v846_v56 = vmax.f32 %v756_v48, 0.0 }
 0x127   : > { %875 = vst [vmem:[%s1322_s14 + $0xa0] sm:$0xff] %v811_v51  ;;  %907 = vst [vmem:[%s1322_s14 + $0x1a0] sm:$0xff] %v843_v52  ;;  %v812_v57 = vmax.f32 %v620_v53, 0.0  ;;  %v844_v58 = vmax.f32 %v748_v54, 0.0 }
 0x128   : > { %878 = vst [vmem:[%s1322_s14 + $0xb8] sm:$0xff] %v814_v55  ;;  %910 = vst [vmem:[%s1322_s14 + $0x1b8] sm:$0xff] %v846_v56 }
 0x129   : > { %876 = vst [vmem:[%s1322_s14 + $0xa8] sm:$0xff] %v812_v57  ;;  %908 = vst [vmem:[%s1322_s14 + $0x1a8] sm:$0xff] %v844_v58  ;;  %v1109_v59 = vpop.f32.mrb[24].mxu0  ;;  %v1141_v60 = vpop.f32.mrb[24].mxu1 }
 0x12a   : > { %v641_v61 = vadd.f32 %v1109_v59, %v1314_v40  ;;  %v769_v62 = vadd.f32 %v1141_v60, %v1314_v40  ;;  %v632_v63 = vpop.f32.mrb[25].mxu0  ;;  %v760_v0 = vpop.f32.mrb[25].mxu1 }
 0x12b   : > { %v633_v1 = vadd.f32 %v1314_v40, %v632_v63  ;;  %v761_v2 = vadd.f32 %v1314_v40, %v760_v0  ;;  %v1110_v3 = vpop.f32.mrb[26].mxu0  ;;  %v1142_v4 = vpop.f32.mrb[26].mxu1 }
 0x12c   : > { %v817_v5 = vmax.f32 %v641_v61, 0.0  ;;  %v849_v6 = vmax.f32 %v769_v62, 0.0  ;;  %v644_v7 = vadd.f32 %v1110_v3, %v1314_v40  ;;  %v772_v8 = vadd.f32 %v1142_v4, %v1314_v40  ;;  %v635_v9 = vpop.f32.mrb[27].mxu0  ;;  %v763_v10 = vpop.f32.mrb[27].mxu1 }
 0x12d   : > { %v815_v11 = vmax.f32 %v633_v1, 0.0  ;;  %v847_v12 = vmax.f32 %v761_v2, 0.0  ;;  %v636_v13 = vadd.f32 %v1314_v40, %v635_v9  ;;  %v764_v14 = vadd.f32 %v1314_v40, %v763_v10 }
 0x12e   : > { %881 = vst [vmem:[%s1322_s14 + $0xd0] sm:$0xff] %v817_v5  ;;  %913 = vst [vmem:[%s1322_s14 + $0x1d0] sm:$0xff] %v849_v6  ;;  %v818_v15 = vmax.f32 %v644_v7, 0.0  ;;  %v850_v16 = vmax.f32 %v772_v8, 0.0 }
 0x12f   : > { %879 = vst [vmem:[%s1322_s14 + $0xc0] sm:$0xff] %v815_v11  ;;  %911 = vst [vmem:[%s1322_s14 + $0x1c0] sm:$0xff] %v847_v12  ;;  %v816_v17 = vmax.f32 %v636_v13, 0.0  ;;  %v848_v18 = vmax.f32 %v764_v14, 0.0 }
 0x130   : > { %882 = vst [vmem:[%s1322_s14 + $0xd8] sm:$0xff] %v818_v15  ;;  %914 = vst [vmem:[%s1322_s14 + $0x1d8] sm:$0xff] %v850_v16 }
 0x131   : > { %880 = vst [vmem:[%s1322_s14 + $0xc8] sm:$0xff] %v816_v17  ;;  %912 = vst [vmem:[%s1322_s14 + $0x1c8] sm:$0xff] %v848_v18  ;;  %v1113_v19 = vpop.f32.mrb[28].mxu0  ;;  %v1145_v20 = vpop.f32.mrb[28].mxu1 }
 0x132   : > { %v657_v21 = vadd.f32 %v1113_v19, %v1314_v40  ;;  %v785_v22 = vadd.f32 %v1145_v20, %v1314_v40  ;;  %v648_v23 = vpop.f32.mrb[29].mxu0  ;;  %v776_v24 = vpop.f32.mrb[29].mxu1 }
 0x133   : > { %v649_v25 = vadd.f32 %v1314_v40, %v648_v23  ;;  %v777_v26 = vadd.f32 %v1314_v40, %v776_v24  ;;  %v1114_v27 = vpop.f32.mrb[30].mxu0  ;;  %v1146_v28 = vpop.f32.mrb[30].mxu1 }
 0x134   : > { %v821_v29 = vmax.f32 %v657_v21, 0.0  ;;  %v853_v30 = vmax.f32 %v785_v22, 0.0  ;;  %v660_v31 = vadd.f32 %v1114_v27, %v1314_v40  ;;  %v788_v32 = vadd.f32 %v1146_v28, %v1314_v40  ;;  %v651_v33 = vpop.f32.mrb[31].mxu0  ;;  %v779_v34 = vpop.f32.mrb[31].mxu1 }
 0x135   : > { %v819_v35 = vmax.f32 %v649_v25, 0.0  ;;  %v851_v36 = vmax.f32 %v777_v26, 0.0  ;;  %v652_v37 = vadd.f32 %v1314_v40, %v651_v33  ;;  %v780_v38 = vadd.f32 %v1314_v40, %v779_v34 }
 0x136   : > { %885 = vst [vmem:[%s1322_s14 + $0xf0] sm:$0xff] %v821_v29  ;;  %917 = vst [vmem:[%s1322_s14 + $0x1f0] sm:$0xff] %v853_v30  ;;  %v822_v39 = vmax.f32 %v660_v31, 0.0  ;;  %v854_v41 = vmax.f32 %v788_v32, 0.0 }
 0x137   : > { %883 = vst [vmem:[%s1322_s14 + $0xe0] sm:$0xff] %v819_v35  ;;  %915 = vst [vmem:[%s1322_s14 + $0x1e0] sm:$0xff] %v851_v36  ;;  %v820_v42 = vmax.f32 %v652_v37, 0.0  ;;  %v852_v43 = vmax.f32 %v780_v38, 0.0 }
 0x138   : > { %886 = vst [vmem:[%s1322_s14 + $0xf8] sm:$0xff] %v822_v39  ;;  %918 = vst [vmem:[%s1322_s14 + $0x1f8] sm:$0xff] %v854_v41 }
 0x139   : > { %884 = vst [vmem:[%s1322_s14 + $0xe8] sm:$0xff] %v820_v42  ;;  %916 = vst [vmem:[%s1322_s14 + $0x1e8] sm:$0xff] %v852_v43 }
 0x13a PF: > { %s13_s12 = sadd.s32 1, %s1217_s12  }
 0x13b   : > { %p10_p4 = scmp.ge.s32.totalorder %s13_s12, 6  }
 0x13d   :  { %12 = sbr.rel (!%p10_p4) target bundleno = 1 (0x1), region = 62 }

// kernel: classifier_cnn_forward.6
= control target key start
LH: loop header
LB: loop body
LE: loop exit
PB: predicated region body
PF: predicated region fallthrough
CT: control target
= control target key end

     0   :  { %s1173_s0 = inlined_call_operand.vmem [shape: f32[392,128], index: 0, kind: input, shape index: {}]   ;;  %s1174_s1 = inlined_call_operand.vmem [shape: f32[392,128], index: 1, kind: input, shape index: {}]   ;;  %s1175_s2 = inlined_call_operand.vmem [shape: f32[392,128], index: 2, kind: input, shape index: {}]   ;;  %s1176_s3 = inlined_call_operand.vmem [shape: f32[392,128], index: 3, kind: input, shape index: {}]   ;;  %s1177_s4 = inlined_call_operand.vmem [shape: f32[392,128], index: 4, kind: output, shape index: {}]  }
   0x1   :  { %v17_v0 = vld [vmem:[%s1173_s0] sm:$0xff]  ;;  %v18_v5 = vld [vmem:[%s1173_s0 + $0x8] sm:$0xff]  ;;  %v19_v11 = vld [vmem:[%s1173_s0 + $0x10] sm:$0xff] }
   0x2   :  { %v66_v1 = vld [vmem:[%s1174_s1] sm:$0xff]  ;;  %v67_v6 = vld [vmem:[%s1174_s1 + $0x8] sm:$0xff]  ;;  %v68_v13 = vld [vmem:[%s1174_s1 + $0x10] sm:$0xff] }
   0x3   :  { %v164_v2 = vld [vmem:[%s1175_s2] sm:$0xff]  ;;  %v115_v3 = vmax.f32 %v17_v0, %v66_v1  ;;  %v116_v8 = vmax.f32 %v18_v5, %v67_v6  ;;  %v165_v9 = vld [vmem:[%s1175_s2 + $0x8] sm:$0xff]  ;;  %v166_v14 = vld [vmem:[%s1175_s2 + $0x10] sm:$0xff]  ;;  %v117_v17 = vmax.f32 %v19_v11, %v68_v13 }
   0x4   :  { %v213_v4 = vld [vmem:[%s1176_s3] sm:$0xff]  ;;  %v214_v10 = vld [vmem:[%s1176_s3 + $0x8] sm:$0xff]  ;;  %v215_v15 = vld [vmem:[%s1176_s3 + $0x10] sm:$0xff] }
   0x5   :  { %v262_v7 = vmax.f32 %v164_v2, %v213_v4  ;;  %v263_v12 = vmax.f32 %v165_v9, %v214_v10  ;;  %v264_v18 = vmax.f32 %v166_v14, %v215_v15  ;;  %v20_v19 = vld [vmem:[%s1173_s0 + $0x18] sm:$0xff]  ;;  %v21_v25 = vld [vmem:[%s1173_s0 + $0x20] sm:$0xff]  ;;  %v22_v32 = vld [vmem:[%s1173_s0 + $0x28] sm:$0xff] }
   0x6   :  { %v69_v20 = vld [vmem:[%s1174_s1 + $0x18] sm:$0xff]  ;;  %v70_v26 = vld [vmem:[%s1174_s1 + $0x20] sm:$0xff]  ;;  %v71_v34 = vld [vmem:[%s1174_s1 + $0x28] sm:$0xff] }
   0x7   :  { %v311_v16 = vmax.f32 %v115_v3, %v262_v7  ;;  %v167_v21 = vld [vmem:[%s1175_s2 + $0x18] sm:$0xff]  ;;  %v312_v22 = vmax.f32 %v116_v8, %v263_v12  ;;  %v118_v23 = vmax.f32 %v20_v19, %v69_v20  ;;  %v313_v27 = vmax.f32 %v117_v17, %v264_v18  ;;  %v168_v30 = vld [vmem:[%s1175_s2 + $0x20] sm:$0xff]  ;;  %v169_v35 = vld [vmem:[%s1175_s2 + $0x28] sm:$0xff] }
   0x8   :  { %v216_v24 = vld [vmem:[%s1176_s3 + $0x18] sm:$0xff]  ;;  %v119_v29 = vmax.f32 %v21_v25, %v70_v26  ;;  %v217_v31 = vld [vmem:[%s1176_s3 + $0x20] sm:$0xff]  ;;  %v218_v36 = vld [vmem:[%s1176_s3 + $0x28] sm:$0xff]  ;;  %v120_v38 = vmax.f32 %v22_v32, %v71_v34 }
   0x9   :  { %360 = vst [vmem:[%s1177_s4] sm:$0xff] %v311_v16  ;;  %v265_v28 = vmax.f32 %v167_v21, %v216_v24  ;;  %361 = vst [vmem:[%s1177_s4 + $0x8] sm:$0xff] %v312_v22  ;;  %v266_v33 = vmax.f32 %v168_v30, %v217_v31  ;;  %v267_v39 = vmax.f32 %v169_v35, %v218_v36  ;;  %v23_v40 = vld [vmem:[%s1173_s0 + $0x30] sm:$0xff]  ;;  %v24_v46 = vld [vmem:[%s1173_s0 + $0x38] sm:$0xff] }
   0xa   :  { %362 = vst [vmem:[%s1177_s4 + $0x10] sm:$0xff] %v313_v27  ;;  %v72_v41 = vld [vmem:[%s1174_s1 + $0x30] sm:$0xff]  ;;  %v73_v47 = vld [vmem:[%s1174_s1 + $0x38] sm:$0xff]  ;;  %v25_v53 = vld [vmem:[%s1173_s0 + $0x40] sm:$0xff] }
   0xb   :  { %v314_v37 = vmax.f32 %v118_v23, %v265_v28  ;;  %v170_v42 = vld [vmem:[%s1175_s2 + $0x30] sm:$0xff]  ;;  %v315_v43 = vmax.f32 %v119_v29, %v266_v33  ;;  %v121_v44 = vmax.f32 %v23_v40, %v72_v41  ;;  %v316_v48 = vmax.f32 %v120_v38, %v267_v39  ;;  %v171_v51 = vld [vmem:[%s1175_s2 + $0x38] sm:$0xff]  ;;  %v74_v55 = vld [vmem:[%s1174_s1 + $0x40] sm:$0xff] }
   0xc   :  { %v219_v45 = vld [vmem:[%s1176_s3 + $0x30] sm:$0xff]  ;;  %v122_v50 = vmax.f32 %v24_v46, %v73_v47  ;;  %v220_v52 = vld [vmem:[%s1176_s3 + $0x38] sm:$0xff]  ;;  %v172_v56 = vld [vmem:[%s1175_s2 + $0x40] sm:$0xff]  ;;  %v123_v59 = vmax.f32 %v25_v53, %v74_v55 }
   0xd   :  { %363 = vst [vmem:[%s1177_s4 + $0x18] sm:$0xff] %v314_v37  ;;  %v268_v49 = vmax.f32 %v170_v42, %v219_v45  ;;  %364 = vst [vmem:[%s1177_s4 + $0x20] sm:$0xff] %v315_v43  ;;  %v269_v54 = vmax.f32 %v171_v51, %v220_v52  ;;  %v221_v57 = vld [vmem:[%s1176_s3 + $0x40] sm:$0xff]  ;;  %v26_v61 = vld [vmem:[%s1173_s0 + $0x48] sm:$0xff] }
   0xe   :  { %365 = vst [vmem:[%s1177_s4 + $0x28] sm:$0xff] %v316_v48  ;;  %v270_v60 = vmax.f32 %v172_v56, %v221_v57  ;;  %v75_v62 = vld [vmem:[%s1174_s1 + $0x48] sm:$0xff]  ;;  %v27_v3 = vld [vmem:[%s1173_s0 + $0x50] sm:$0xff]  ;;  %v28_v10 = vld [vmem:[%s1173_s0 + $0x58] sm:$0xff] }
   0xf   :  { %v317_v58 = vmax.f32 %v121_v44, %v268_v49  ;;  %v173_v63 = vld [vmem:[%s1175_s2 + $0x48] sm:$0xff]  ;;  %v318_v0 = vmax.f32 %v122_v50, %v269_v54  ;;  %v124_v1 = vmax.f32 %v26_v61, %v75_v62  ;;  %v76_v4 = vld [vmem:[%s1174_s1 + $0x50] sm:$0xff]  ;;  %v77_v12 = vld [vmem:[%s1174_s1 + $0x58] sm:$0xff] }
  0x10   :  { %v222_v2 = vld [vmem:[%s1176_s3 + $0x48] sm:$0xff]  ;;  %v319_v5 = vmax.f32 %v123_v59, %v270_v60  ;;  %v125_v7 = vmax.f32 %v27_v3, %v76_v4  ;;  %v174_v8 = vld [vmem:[%s1175_s2 + $0x50] sm:$0xff]  ;;  %v175_v13 = vld [vmem:[%s1175_s2 + $0x58] sm:$0xff]  ;;  %v126_v16 = vmax.f32 %v28_v10, %v77_v12 }
  0x11   :  { %366 = vst [vmem:[%s1177_s4 + $0x30] sm:$0xff] %v317_v58  ;;  %v271_v6 = vmax.f32 %v173_v63, %v222_v2  ;;  %v223_v9 = vld [vmem:[%s1176_s3 + $0x50] sm:$0xff]  ;;  %367 = vst [vmem:[%s1177_s4 + $0x38] sm:$0xff] %v318_v0  ;;  %v224_v14 = vld [vmem:[%s1176_s3 + $0x58] sm:$0xff] }
  0x12   :  { %v272_v11 = vmax.f32 %v174_v8, %v223_v9  ;;  %368 = vst [vmem:[%s1177_s4 + $0x40] sm:$0xff] %v319_v5  ;;  %v273_v17 = vmax.f32 %v175_v13, %v224_v14  ;;  %v29_v18 = vld [vmem:[%s1173_s0 + $0x60] sm:$0xff]  ;;  %v30_v24 = vld [vmem:[%s1173_s0 + $0x68] sm:$0xff]  ;;  %v31_v31 = vld [vmem:[%s1173_s0 + $0x70] sm:$0xff] }
  0x13   :  { %v320_v15 = vmax.f32 %v124_v1, %v271_v6  ;;  %v78_v19 = vld [vmem:[%s1174_s1 + $0x60] sm:$0xff]  ;;  %v79_v25 = vld [vmem:[%s1174_s1 + $0x68] sm:$0xff]  ;;  %v80_v33 = vld [vmem:[%s1174_s1 + $0x70] sm:$0xff] }
  0x14   :  { %v176_v20 = vld [vmem:[%s1175_s2 + $0x60] sm:$0xff]  ;;  %v321_v21 = vmax.f32 %v125_v7, %v272_v11  ;;  %v127_v22 = vmax.f32 %v29_v18, %v78_v19  ;;  %v322_v26 = vmax.f32 %v126_v16, %v273_v17  ;;  %v128_v28 = vmax.f32 %v30_v24, %v79_v25  ;;  %v177_v29 = vld [vmem:[%s1175_s2 + $0x68] sm:$0xff]  ;;  %v178_v34 = vld [vmem:[%s1175_s2 + $0x70] sm:$0xff] }
  0x15   :  { %v225_v23 = vld [vmem:[%s1176_s3 + $0x60] sm:$0xff]  ;;  %369 = vst [vmem:[%s1177_s4 + $0x48] sm:$0xff] %v320_v15  ;;  %v226_v30 = vld [vmem:[%s1176_s3 + $0x68] sm:$0xff]  ;;  %v227_v35 = vld [vmem:[%s1176_s3 + $0x70] sm:$0xff]  ;;  %v129_v37 = vmax.f32 %v31_v31, %v80_v33 }
  0x16   :  { %v274_v27 = vmax.f32 %v176_v20, %v225_v23  ;;  %370 = vst [vmem:[%s1177_s4 + $0x50] sm:$0xff] %v321_v21  ;;  %v275_v32 = vmax.f32 %v177_v29, %v226_v30  ;;  %371 = vst [vmem:[%s1177_s4 + $0x58] sm:$0xff] %v322_v26  ;;  %v276_v38 = vmax.f32 %v178_v34, %v227_v35  ;;  %v32_v39 = vld [vmem:[%s1173_s0 + $0x78] sm:$0xff]  ;;  %v33_v45 = vld [vmem:[%s1173_s0 + $0x80] sm:$0xff] }
  0x17   :  { %v81_v40 = vld [vmem:[%s1174_s1 + $0x78] sm:$0xff]  ;;  %v82_v46 = vld [vmem:[%s1174_s1 + $0x80] sm:$0xff]  ;;  %v34_v52 = vld [vmem:[%s1173_s0 + $0x88] sm:$0xff] }
  0x18   :  { %v323_v36 = vmax.f32 %v127_v22, %v274_v27  ;;  %v179_v41 = vld [vmem:[%s1175_s2 + $0x78] sm:$0xff]  ;;  %v324_v42 = vmax.f32 %v128_v28, %v275_v32  ;;  %v130_v43 = vmax.f32 %v32_v39, %v81_v40  ;;  %v325_v47 = vmax.f32 %v129_v37, %v276_v38  ;;  %v180_v50 = vld [vmem:[%s1175_s2 + $0x80] sm:$0xff]  ;;  %v83_v54 = vld [vmem:[%s1174_s1 + $0x88] sm:$0xff] }
  0x19   :  { %v228_v44 = vld [vmem:[%s1176_s3 + $0x78] sm:$0xff]  ;;  %v131_v49 = vmax.f32 %v33_v45, %v82_v46  ;;  %v229_v51 = vld [vmem:[%s1176_s3 + $0x80] sm:$0xff]  ;;  %v181_v55 = vld [vmem:[%s1175_s2 + $0x88] sm:$0xff]  ;;  %v132_v58 = vmax.f32 %v34_v52, %v83_v54 }
  0x1a   :  { %372 = vst [vmem:[%s1177_s4 + $0x60] sm:$0xff] %v323_v36  ;;  %v277_v48 = vmax.f32 %v179_v41, %v228_v44  ;;  %373 = vst [vmem:[%s1177_s4 + $0x68] sm:$0xff] %v324_v42  ;;  %v278_v53 = vmax.f32 %v180_v50, %v229_v51  ;;  %v230_v56 = vld [vmem:[%s1176_s3 + $0x88] sm:$0xff]  ;;  %v35_v60 = vld [vmem:[%s1173_s0 + $0x90] sm:$0xff] }
  0x1b   :  { %374 = vst [vmem:[%s1177_s4 + $0x70] sm:$0xff] %v325_v47  ;;  %v279_v59 = vmax.f32 %v181_v55, %v230_v56  ;;  %v84_v61 = vld [vmem:[%s1174_s1 + $0x90] sm:$0xff]  ;;  %v36_v2 = vld [vmem:[%s1173_s0 + $0x98] sm:$0xff]  ;;  %v37_v9 = vld [vmem:[%s1173_s0 + $0xa0] sm:$0xff] }
  0x1c   :  { %v326_v57 = vmax.f32 %v130_v43, %v277_v48  ;;  %v182_v62 = vld [vmem:[%s1175_s2 + $0x90] sm:$0xff]  ;;  %v327_v63 = vmax.f32 %v131_v49, %v278_v53  ;;  %v133_v0 = vmax.f32 %v35_v60, %v84_v61  ;;  %v85_v3 = vld [vmem:[%s1174_s1 + $0x98] sm:$0xff]  ;;  %v86_v11 = vld [vmem:[%s1174_s1 + $0xa0] sm:$0xff] }
  0x1d   :  { %v231_v1 = vld [vmem:[%s1176_s3 + $0x90] sm:$0xff]  ;;  %v328_v4 = vmax.f32 %v132_v58, %v279_v59  ;;  %v134_v6 = vmax.f32 %v36_v2, %v85_v3  ;;  %v183_v7 = vld [vmem:[%s1175_s2 + $0x98] sm:$0xff]  ;;  %v184_v12 = vld [vmem:[%s1175_s2 + $0xa0] sm:$0xff]  ;;  %v135_v15 = vmax.f32 %v37_v9, %v86_v11 }
  0x1e   :  { %375 = vst [vmem:[%s1177_s4 + $0x78] sm:$0xff] %v326_v57  ;;  %v280_v5 = vmax.f32 %v182_v62, %v231_v1  ;;  %v232_v8 = vld [vmem:[%s1176_s3 + $0x98] sm:$0xff]  ;;  %376 = vst [vmem:[%s1177_s4 + $0x80] sm:$0xff] %v327_v63  ;;  %v233_v13 = vld [vmem:[%s1176_s3 + $0xa0] sm:$0xff] }
  0x1f   :  { %v281_v10 = vmax.f32 %v183_v7, %v232_v8  ;;  %377 = vst [vmem:[%s1177_s4 + $0x88] sm:$0xff] %v328_v4  ;;  %v282_v16 = vmax.f32 %v184_v12, %v233_v13  ;;  %v38_v17 = vld [vmem:[%s1173_s0 + $0xa8] sm:$0xff]  ;;  %v39_v23 = vld [vmem:[%s1173_s0 + $0xb0] sm:$0xff]  ;;  %v40_v30 = vld [vmem:[%s1173_s0 + $0xb8] sm:$0xff] }
  0x20   :  { %v329_v14 = vmax.f32 %v133_v0, %v280_v5  ;;  %v87_v18 = vld [vmem:[%s1174_s1 + $0xa8] sm:$0xff]  ;;  %v88_v24 = vld [vmem:[%s1174_s1 + $0xb0] sm:$0xff]  ;;  %v89_v32 = vld [vmem:[%s1174_s1 + $0xb8] sm:$0xff] }
  0x21   :  { %v185_v19 = vld [vmem:[%s1175_s2 + $0xa8] sm:$0xff]  ;;  %v330_v20 = vmax.f32 %v134_v6, %v281_v10  ;;  %v136_v21 = vmax.f32 %v38_v17, %v87_v18  ;;  %v331_v25 = vmax.f32 %v135_v15, %v282_v16  ;;  %v137_v27 = vmax.f32 %v39_v23, %v88_v24  ;;  %v186_v28 = vld [vmem:[%s1175_s2 + $0xb0] sm:$0xff]  ;;  %v187_v33 = vld [vmem:[%s1175_s2 + $0xb8] sm:$0xff] }
  0x22   :  { %v234_v22 = vld [vmem:[%s1176_s3 + $0xa8] sm:$0xff]  ;;  %378 = vst [vmem:[%s1177_s4 + $0x90] sm:$0xff] %v329_v14  ;;  %v235_v29 = vld [vmem:[%s1176_s3 + $0xb0] sm:$0xff]  ;;  %v236_v34 = vld [vmem:[%s1176_s3 + $0xb8] sm:$0xff]  ;;  %v138_v36 = vmax.f32 %v40_v30, %v89_v32 }
  0x23   :  { %v283_v26 = vmax.f32 %v185_v19, %v234_v22  ;;  %379 = vst [vmem:[%s1177_s4 + $0x98] sm:$0xff] %v330_v20  ;;  %v284_v31 = vmax.f32 %v186_v28, %v235_v29  ;;  %380 = vst [vmem:[%s1177_s4 + $0xa0] sm:$0xff] %v331_v25  ;;  %v285_v37 = vmax.f32 %v187_v33, %v236_v34  ;;  %v41_v38 = vld [vmem:[%s1173_s0 + $0xc0] sm:$0xff]  ;;  %v42_v44 = vld [vmem:[%s1173_s0 + $0xc8] sm:$0xff] }
  0x24   :  { %v90_v39 = vld [vmem:[%s1174_s1 + $0xc0] sm:$0xff]  ;;  %v91_v45 = vld [vmem:[%s1174_s1 + $0xc8] sm:$0xff]  ;;  %v43_v51 = vld [vmem:[%s1173_s0 + $0xd0] sm:$0xff] }
  0x25   :  { %v332_v35 = vmax.f32 %v136_v21, %v283_v26  ;;  %v188_v40 = vld [vmem:[%s1175_s2 + $0xc0] sm:$0xff]  ;;  %v333_v41 = vmax.f32 %v137_v27, %v284_v31  ;;  %v139_v42 = vmax.f32 %v41_v38, %v90_v39  ;;  %v334_v46 = vmax.f32 %v138_v36, %v285_v37  ;;  %v189_v49 = vld [vmem:[%s1175_s2 + $0xc8] sm:$0xff]  ;;  %v92_v53 = vld [vmem:[%s1174_s1 + $0xd0] sm:$0xff] }
  0x26   :  { %v237_v43 = vld [vmem:[%s1176_s3 + $0xc0] sm:$0xff]  ;;  %v140_v48 = vmax.f32 %v42_v44, %v91_v45  ;;  %v238_v50 = vld [vmem:[%s1176_s3 + $0xc8] sm:$0xff]  ;;  %v190_v54 = vld [vmem:[%s1175_s2 + $0xd0] sm:$0xff]  ;;  %v141_v57 = vmax.f32 %v43_v51, %v92_v53 }
  0x27   :  { %381 = vst [vmem:[%s1177_s4 + $0xa8] sm:$0xff] %v332_v35  ;;  %v286_v47 = vmax.f32 %v188_v40, %v237_v43  ;;  %382 = vst [vmem:[%s1177_s4 + $0xb0] sm:$0xff] %v333_v41  ;;  %v287_v52 = vmax.f32 %v189_v49, %v238_v50  ;;  %v239_v55 = vld [vmem:[%s1176_s3 + $0xd0] sm:$0xff]  ;;  %v44_v59 = vld [vmem:[%s1173_s0 + $0xd8] sm:$0xff] }
  0x28   :  { %383 = vst [vmem:[%s1177_s4 + $0xb8] sm:$0xff] %v334_v46  ;;  %v288_v58 = vmax.f32 %v190_v54, %v239_v55  ;;  %v93_v60 = vld [vmem:[%s1174_s1 + $0xd8] sm:$0xff]  ;;  %v45_v1 = vld [vmem:[%s1173_s0 + $0xe0] sm:$0xff]  ;;  %v46_v8 = vld [vmem:[%s1173_s0 + $0xe8] sm:$0xff] }
  0x29   :  { %v335_v56 = vmax.f32 %v139_v42, %v286_v47  ;;  %v191_v61 = vld [vmem:[%s1175_s2 + $0xd8] sm:$0xff]  ;;  %v336_v62 = vmax.f32 %v140_v48, %v287_v52  ;;  %v142_v63 = vmax.f32 %v44_v59, %v93_v60  ;;  %v94_v2 = vld [vmem:[%s1174_s1 + $0xe0] sm:$0xff]  ;;  %v95_v10 = vld [vmem:[%s1174_s1 + $0xe8] sm:$0xff] }
  0x2a   :  { %v240_v0 = vld [vmem:[%s1176_s3 + $0xd8] sm:$0xff]  ;;  %v337_v3 = vmax.f32 %v141_v57, %v288_v58  ;;  %v143_v5 = vmax.f32 %v45_v1, %v94_v2  ;;  %v192_v6 = vld [vmem:[%s1175_s2 + $0xe0] sm:$0xff]  ;;  %v193_v11 = vld [vmem:[%s1175_s2 + $0xe8] sm:$0xff]  ;;  %v144_v14 = vmax.f32 %v46_v8, %v95_v10 }
  0x2b   :  { %384 = vst [vmem:[%s1177_s4 + $0xc0] sm:$0xff] %v335_v56  ;;  %v289_v4 = vmax.f32 %v191_v61, %v240_v0  ;;  %v241_v7 = vld [vmem:[%s1176_s3 + $0xe0] sm:$0xff]  ;;  %385 = vst [vmem:[%s1177_s4 + $0xc8] sm:$0xff] %v336_v62  ;;  %v242_v12 = vld [vmem:[%s1176_s3 + $0xe8] sm:$0xff] }
  0x2c   :  { %v290_v9 = vmax.f32 %v192_v6, %v241_v7  ;;  %386 = vst [vmem:[%s1177_s4 + $0xd0] sm:$0xff] %v337_v3  ;;  %v291_v15 = vmax.f32 %v193_v11, %v242_v12  ;;  %v47_v16 = vld [vmem:[%s1173_s0 + $0xf0] sm:$0xff]  ;;  %v48_v22 = vld [vmem:[%s1173_s0 + $0xf8] sm:$0xff]  ;;  %v49_v29 = vld [vmem:[%s1173_s0 + $0x100] sm:$0xff] }
  0x2d   :  { %v338_v13 = vmax.f32 %v142_v63, %v289_v4  ;;  %v96_v17 = vld [vmem:[%s1174_s1 + $0xf0] sm:$0xff]  ;;  %v97_v23 = vld [vmem:[%s1174_s1 + $0xf8] sm:$0xff]  ;;  %v98_v31 = vld [vmem:[%s1174_s1 + $0x100] sm:$0xff] }
  0x2e   :  { %v194_v18 = vld [vmem:[%s1175_s2 + $0xf0] sm:$0xff]  ;;  %v339_v19 = vmax.f32 %v143_v5, %v290_v9  ;;  %v145_v20 = vmax.f32 %v47_v16, %v96_v17  ;;  %v340_v24 = vmax.f32 %v144_v14, %v291_v15  ;;  %v146_v26 = vmax.f32 %v48_v22, %v97_v23  ;;  %v195_v27 = vld [vmem:[%s1175_s2 + $0xf8] sm:$0xff]  ;;  %v196_v32 = vld [vmem:[%s1175_s2 + $0x100] sm:$0xff] }
  0x2f   :  { %v243_v21 = vld [vmem:[%s1176_s3 + $0xf0] sm:$0xff]  ;;  %387 = vst [vmem:[%s1177_s4 + $0xd8] sm:$0xff] %v338_v13  ;;  %v244_v28 = vld [vmem:[%s1176_s3 + $0xf8] sm:$0xff]  ;;  %v245_v33 = vld [vmem:[%s1176_s3 + $0x100] sm:$0xff]  ;;  %v147_v35 = vmax.f32 %v49_v29, %v98_v31 }
  0x30   :  { %v292_v25 = vmax.f32 %v194_v18, %v243_v21  ;;  %388 = vst [vmem:[%s1177_s4 + $0xe0] sm:$0xff] %v339_v19  ;;  %v293_v30 = vmax.f32 %v195_v27, %v244_v28  ;;  %389 = vst [vmem:[%s1177_s4 + $0xe8] sm:$0xff] %v340_v24  ;;  %v294_v36 = vmax.f32 %v196_v32, %v245_v33  ;;  %v50_v37 = vld [vmem:[%s1173_s0 + $0x108] sm:$0xff]  ;;  %v51_v43 = vld [vmem:[%s1173_s0 + $0x110] sm:$0xff] }
  0x31   :  { %v99_v38 = vld [vmem:[%s1174_s1 + $0x108] sm:$0xff]  ;;  %v100_v44 = vld [vmem:[%s1174_s1 + $0x110] sm:$0xff]  ;;  %v52_v50 = vld [vmem:[%s1173_s0 + $0x118] sm:$0xff] }
  0x32   :  { %v341_v34 = vmax.f32 %v145_v20, %v292_v25  ;;  %v197_v39 = vld [vmem:[%s1175_s2 + $0x108] sm:$0xff]  ;;  %v342_v40 = vmax.f32 %v146_v26, %v293_v30  ;;  %v148_v41 = vmax.f32 %v50_v37, %v99_v38  ;;  %v343_v45 = vmax.f32 %v147_v35, %v294_v36  ;;  %v198_v48 = vld [vmem:[%s1175_s2 + $0x110] sm:$0xff]  ;;  %v101_v52 = vld [vmem:[%s1174_s1 + $0x118] sm:$0xff] }
  0x33   :  { %v246_v42 = vld [vmem:[%s1176_s3 + $0x108] sm:$0xff]  ;;  %v149_v47 = vmax.f32 %v51_v43, %v100_v44  ;;  %v247_v49 = vld [vmem:[%s1176_s3 + $0x110] sm:$0xff]  ;;  %v199_v53 = vld [vmem:[%s1175_s2 + $0x118] sm:$0xff]  ;;  %v150_v56 = vmax.f32 %v52_v50, %v101_v52 }
  0x34   :  { %390 = vst [vmem:[%s1177_s4 + $0xf0] sm:$0xff] %v341_v34  ;;  %v295_v46 = vmax.f32 %v197_v39, %v246_v42  ;;  %391 = vst [vmem:[%s1177_s4 + $0xf8] sm:$0xff] %v342_v40  ;;  %v296_v51 = vmax.f32 %v198_v48, %v247_v49  ;;  %v248_v54 = vld [vmem:[%s1176_s3 + $0x118] sm:$0xff]  ;;  %v53_v58 = vld [vmem:[%s1173_s0 + $0x120] sm:$0xff] }
  0x35   :  { %392 = vst [vmem:[%s1177_s4 + $0x100] sm:$0xff] %v343_v45  ;;  %v297_v57 = vmax.f32 %v199_v53, %v248_v54  ;;  %v102_v59 = vld [vmem:[%s1174_s1 + $0x120] sm:$0xff]  ;;  %v54_v0 = vld [vmem:[%s1173_s0 + $0x128] sm:$0xff]  ;;  %v55_v7 = vld [vmem:[%s1173_s0 + $0x130] sm:$0xff] }
  0x36   :  { %v344_v55 = vmax.f32 %v148_v41, %v295_v46  ;;  %v200_v60 = vld [vmem:[%s1175_s2 + $0x120] sm:$0xff]  ;;  %v345_v61 = vmax.f32 %v149_v47, %v296_v51  ;;  %v151_v62 = vmax.f32 %v53_v58, %v102_v59  ;;  %v103_v1 = vld [vmem:[%s1174_s1 + $0x128] sm:$0xff]  ;;  %v104_v9 = vld [vmem:[%s1174_s1 + $0x130] sm:$0xff] }
  0x37   :  { %v249_v63 = vld [vmem:[%s1176_s3 + $0x120] sm:$0xff]  ;;  %v346_v2 = vmax.f32 %v150_v56, %v297_v57  ;;  %v152_v4 = vmax.f32 %v54_v0, %v103_v1  ;;  %v201_v5 = vld [vmem:[%s1175_s2 + $0x128] sm:$0xff]  ;;  %v202_v10 = vld [vmem:[%s1175_s2 + $0x130] sm:$0xff]  ;;  %v153_v13 = vmax.f32 %v55_v7, %v104_v9 }
  0x38   :  { %393 = vst [vmem:[%s1177_s4 + $0x108] sm:$0xff] %v344_v55  ;;  %v298_v3 = vmax.f32 %v200_v60, %v249_v63  ;;  %v250_v6 = vld [vmem:[%s1176_s3 + $0x128] sm:$0xff]  ;;  %394 = vst [vmem:[%s1177_s4 + $0x110] sm:$0xff] %v345_v61  ;;  %v251_v11 = vld [vmem:[%s1176_s3 + $0x130] sm:$0xff] }
  0x39   :  { %v299_v8 = vmax.f32 %v201_v5, %v250_v6  ;;  %395 = vst [vmem:[%s1177_s4 + $0x118] sm:$0xff] %v346_v2  ;;  %v300_v14 = vmax.f32 %v202_v10, %v251_v11  ;;  %v56_v15 = vld [vmem:[%s1173_s0 + $0x138] sm:$0xff]  ;;  %v57_v21 = vld [vmem:[%s1173_s0 + $0x140] sm:$0xff]  ;;  %v58_v28 = vld [vmem:[%s1173_s0 + $0x148] sm:$0xff] }
  0x3a   :  { %v347_v12 = vmax.f32 %v151_v62, %v298_v3  ;;  %v105_v16 = vld [vmem:[%s1174_s1 + $0x138] sm:$0xff]  ;;  %v106_v22 = vld [vmem:[%s1174_s1 + $0x140] sm:$0xff]  ;;  %v107_v30 = vld [vmem:[%s1174_s1 + $0x148] sm:$0xff] }
  0x3b   :  { %v203_v17 = vld [vmem:[%s1175_s2 + $0x138] sm:$0xff]  ;;  %v348_v18 = vmax.f32 %v152_v4, %v299_v8  ;;  %v154_v19 = vmax.f32 %v56_v15, %v105_v16  ;;  %v349_v23 = vmax.f32 %v153_v13, %v300_v14  ;;  %v155_v25 = vmax.f32 %v57_v21, %v106_v22  ;;  %v204_v26 = vld [vmem:[%s1175_s2 + $0x140] sm:$0xff]  ;;  %v205_v31 = vld [vmem:[%s1175_s2 + $0x148] sm:$0xff] }
  0x3c   :  { %v252_v20 = vld [vmem:[%s1176_s3 + $0x138] sm:$0xff]  ;;  %396 = vst [vmem:[%s1177_s4 + $0x120] sm:$0xff] %v347_v12  ;;  %v253_v27 = vld [vmem:[%s1176_s3 + $0x140] sm:$0xff]  ;;  %v254_v32 = vld [vmem:[%s1176_s3 + $0x148] sm:$0xff]  ;;  %v156_v34 = vmax.f32 %v58_v28, %v107_v30 }
  0x3d   :  { %v301_v24 = vmax.f32 %v203_v17, %v252_v20  ;;  %397 = vst [vmem:[%s1177_s4 + $0x128] sm:$0xff] %v348_v18  ;;  %v302_v29 = vmax.f32 %v204_v26, %v253_v27  ;;  %398 = vst [vmem:[%s1177_s4 + $0x130] sm:$0xff] %v349_v23  ;;  %v303_v35 = vmax.f32 %v205_v31, %v254_v32  ;;  %v59_v36 = vld [vmem:[%s1173_s0 + $0x150] sm:$0xff]  ;;  %v60_v42 = vld [vmem:[%s1173_s0 + $0x158] sm:$0xff] }
  0x3e   :  { %v108_v37 = vld [vmem:[%s1174_s1 + $0x150] sm:$0xff]  ;;  %v109_v43 = vld [vmem:[%s1174_s1 + $0x158] sm:$0xff]  ;;  %v61_v49 = vld [vmem:[%s1173_s0 + $0x160] sm:$0xff] }
  0x3f   :  { %v350_v33 = vmax.f32 %v154_v19, %v301_v24  ;;  %v206_v38 = vld [vmem:[%s1175_s2 + $0x150] sm:$0xff]  ;;  %v351_v39 = vmax.f32 %v155_v25, %v302_v29  ;;  %v157_v40 = vmax.f32 %v59_v36, %v108_v37  ;;  %v352_v44 = vmax.f32 %v156_v34, %v303_v35  ;;  %v207_v47 = vld [vmem:[%s1175_s2 + $0x158] sm:$0xff]  ;;  %v110_v51 = vld [vmem:[%s1174_s1 + $0x160] sm:$0xff] }
  0x40   :  { %v255_v41 = vld [vmem:[%s1176_s3 + $0x150] sm:$0xff]  ;;  %v158_v46 = vmax.f32 %v60_v42, %v109_v43  ;;  %v256_v48 = vld [vmem:[%s1176_s3 + $0x158] sm:$0xff]  ;;  %v208_v52 = vld [vmem:[%s1175_s2 + $0x160] sm:$0xff]  ;;  %v159_v55 = vmax.f32 %v61_v49, %v110_v51 }
  0x41   :  { %399 = vst [vmem:[%s1177_s4 + $0x138] sm:$0xff] %v350_v33  ;;  %v304_v45 = vmax.f32 %v206_v38, %v255_v41  ;;  %400 = vst [vmem:[%s1177_s4 + $0x140] sm:$0xff] %v351_v39  ;;  %v305_v50 = vmax.f32 %v207_v47, %v256_v48  ;;  %v257_v53 = vld [vmem:[%s1176_s3 + $0x160] sm:$0xff]  ;;  %v62_v57 = vld [vmem:[%s1173_s0 + $0x168] sm:$0xff] }
  0x42   :  { %401 = vst [vmem:[%s1177_s4 + $0x148] sm:$0xff] %v352_v44  ;;  %v306_v56 = vmax.f32 %v208_v52, %v257_v53  ;;  %v111_v58 = vld [vmem:[%s1174_s1 + $0x168] sm:$0xff]  ;;  %v63_v63 = vld [vmem:[%s1173_s0 + $0x170] sm:$0xff]  ;;  %v64_v6 = vld [vmem:[%s1173_s0 + $0x178] sm:$0xff] }
  0x43   :  { %v353_v54 = vmax.f32 %v157_v40, %v304_v45  ;;  %v209_v59 = vld [vmem:[%s1175_s2 + $0x168] sm:$0xff]  ;;  %v354_v60 = vmax.f32 %v158_v46, %v305_v50  ;;  %v160_v61 = vmax.f32 %v62_v57, %v111_v58  ;;  %v112_v0 = vld [vmem:[%s1174_s1 + $0x170] sm:$0xff]  ;;  %v113_v8 = vld [vmem:[%s1174_s1 + $0x178] sm:$0xff] }
  0x44   :  { %v258_v62 = vld [vmem:[%s1176_s3 + $0x168] sm:$0xff]  ;;  %v355_v1 = vmax.f32 %v159_v55, %v306_v56  ;;  %v161_v3 = vmax.f32 %v63_v63, %v112_v0  ;;  %v210_v4 = vld [vmem:[%s1175_s2 + $0x170] sm:$0xff]  ;;  %v211_v9 = vld [vmem:[%s1175_s2 + $0x178] sm:$0xff]  ;;  %v162_v12 = vmax.f32 %v64_v6, %v113_v8 }
  0x45   :  { %402 = vst [vmem:[%s1177_s4 + $0x150] sm:$0xff] %v353_v54  ;;  %v307_v2 = vmax.f32 %v209_v59, %v258_v62  ;;  %v259_v5 = vld [vmem:[%s1176_s3 + $0x170] sm:$0xff]  ;;  %403 = vst [vmem:[%s1177_s4 + $0x158] sm:$0xff] %v354_v60  ;;  %v260_v10 = vld [vmem:[%s1176_s3 + $0x178] sm:$0xff] }
  0x46   :  { %v308_v7 = vmax.f32 %v210_v4, %v259_v5  ;;  %404 = vst [vmem:[%s1177_s4 + $0x160] sm:$0xff] %v355_v1  ;;  %v309_v13 = vmax.f32 %v211_v9, %v260_v10  ;;  %v65_v14 = vld [vmem:[%s1173_s0 + $0x180] sm:$0xff] }
  0x47   :  { %v356_v11 = vmax.f32 %v160_v61, %v307_v2  ;;  %v114_v15 = vld [vmem:[%s1174_s1 + $0x180] sm:$0xff] }
  0x48   :  { %v212_v16 = vld [vmem:[%s1175_s2 + $0x180] sm:$0xff]  ;;  %v357_v17 = vmax.f32 %v161_v3, %v308_v7  ;;  %v163_v18 = vmax.f32 %v65_v14, %v114_v15  ;;  %v358_v20 = vmax.f32 %v162_v12, %v309_v13 }
  0x49   :  { %v261_v19 = vld [vmem:[%s1176_s3 + $0x180] sm:$0xff]  ;;  %405 = vst [vmem:[%s1177_s4 + $0x168] sm:$0xff] %v356_v11 }
  0x4a   :  { %v310_v21 = vmax.f32 %v212_v16, %v261_v19  ;;  %406 = vst [vmem:[%s1177_s4 + $0x170] sm:$0xff] %v357_v17  ;;  %407 = vst [vmem:[%s1177_s4 + $0x178] sm:$0xff] %v358_v20 }
  0x4c   :  { %v359_v22 = vmax.f32 %v163_v18, %v310_v21 }
  0x4e   :  { %408 = vst [vmem:[%s1177_s4 + $0x180] sm:$0xff] %v359_v22 }

// kernel: classifier_cnn_forward.7
= control target key start
LH: loop header
LB: loop body
LE: loop exit
PB: predicated region body
PF: predicated region fallthrough
CT: control target
= control target key end

     0   :  { %s947_s1 = inlined_call_operand.vmem [shape: bf16[256,128], index: 1, kind: input, shape index: {}]   ;;  %s948_s0 = inlined_call_operand.vmem [shape: bf16[200,256], index: 0, kind: input, shape index: {}]   ;;  %s949_s2 = inlined_call_operand.vmem [shape: f32[1,128], index: 2, kind: input, shape index: {}]   ;;  %s950_s3 = inlined_call_operand.vmem [shape: f32[200,128], index: 3, kind: output, shape index: {}]  }
   0x1   :  { %v645_v0 = vld [vmem:[%s947_s1 + $0x40] sm:$0xff]   ;;  %v647_v2 = vld [vmem:[%s947_s1 + $0x48] sm:$0xff]   ;;  %v649_v4 = vld [vmem:[%s947_s1 + $0x50] sm:$0xff]  }
   0x2   :  { %v646_v1 = vld [vmem:[%s947_s1] sm:$0xff]   ;;  %535 = vmatprep.subr.bf16.mxu0 %v645_v0  ;;  %629 = vmatprep.subr.bf16.mxu1 %v645_v0  ;;  %v648_v3 = vld [vmem:[%s947_s1 + $0x8] sm:$0xff]   ;;  %v650_v5 = vld [vmem:[%s947_s1 + $0x10] sm:$0xff]  }
   0x3   :  { %536 = vmatpush3.bf16.msra.mxu0 %v646_v1  ;;  %637 = vmatpush3.bf16.msra.mxu1 %v646_v1  ;;  %v651_v6 = vld [vmem:[%s947_s1 + $0x58] sm:$0xff]   ;;  %v653_v8 = vld [vmem:[%s947_s1 + $0x60] sm:$0xff]   ;;  %v655_v10 = vld [vmem:[%s947_s1 + $0x68] sm:$0xff]  }
   0x4   :  { %537 = vmatprep.subr.bf16.mxu0 %v647_v2  ;;  %630 = vmatprep.subr.bf16.mxu1 %v647_v2  ;;  %v652_v7 = vld [vmem:[%s947_s1 + $0x18] sm:$0xff]   ;;  %v654_v9 = vld [vmem:[%s947_s1 + $0x20] sm:$0xff]   ;;  %v656_v13 = vld [vmem:[%s947_s1 + $0x28] sm:$0xff]  }
   0x5   :  { %v663_v11 = vld [vmem:[%s948_s0 + $0x4] ss:$8 sps:$4 sm:$0xff]   ;;  %v666_v12 = vld [vmem:[%s948_s0 + $0x74] ss:$8 sps:$4 sm:$0xff]   ;;  %v661_v18 = vld [vmem:[%s948_s0] ss:$8 sps:$4 sm:$0xff]  }
   0x6   :  { %v657_v14 = vld [vmem:[%s947_s1 + $0x70] sm:$0xff]   ;;  %334 = vmatprep.mubr.bf16.mxu0 %v663_v11  ;;  %390 = vmatprep.mubr.bf16.mxu1 %v666_v12  ;;  %v659_v16 = vld [vmem:[%s947_s1 + $0x78] sm:$0xff]   ;;  %v670_v21 = vld [vmem:[%s948_s0 + $0x84] ss:$8 sps:$4 sm:$0xff]  }
   0x7   :  { %538 = vmatpush3.bf16.msra.mxu0 %v648_v3  ;;  %638 = vmatpush3.bf16.msra.mxu1 %v648_v3  ;;  %v658_v15 = vld [vmem:[%s947_s1 + $0x30] sm:$0xff]   ;;  %v660_v17 = vld [vmem:[%s947_s1 + $0x38] sm:$0xff]   ;;  %v674_v23 = vld [vmem:[%s948_s0 + $0x80] ss:$8 sps:$4 sm:$0xff]  }
   0x8   :  { %539 = vmatprep.subr.bf16.mxu0 %v649_v4  ;;  %631 = vmatprep.subr.bf16.mxu1 %v649_v4  ;;  %v664_v19 = vld [vmem:[%s948_s0 + $0x70] ss:$8 sps:$4 sm:$0xff]   ;;  %v667_v20 = vld [vmem:[%s948_s0 + $0x14] ss:$8 sps:$4 sm:$0xff]   ;;  %v672_v24 = vld [vmem:[%s948_s0 + $0x24] ss:$8 sps:$4 sm:$0xff]  }
   0x9   :  { %v669_v22 = vld [vmem:[%s948_s0 + $0x10] ss:$8 sps:$4 sm:$0xff]   ;;  %v676_v25 = vld [vmem:[%s948_s0 + $0x94] ss:$8 sps:$4 sm:$0xff]   ;;  %v675_v26 = vld [vmem:[%s948_s0 + $0x20] ss:$8 sps:$4 sm:$0xff]  }
   0xa   :  { %v680_v27 = vld [vmem:[%s948_s0 + $0x90] ss:$8 sps:$4 sm:$0xff]   ;;  %v678_v28 = vld [vmem:[%s948_s0 + $0x34] ss:$8 sps:$4 sm:$0xff]   ;;  %v682_v29 = vld [vmem:[%s948_s0 + $0xa4] ss:$8 sps:$4 sm:$0xff]  }
   0xb   :  { %540 = vmatpush3.bf16.msra.mxu0 %v650_v5  ;;  %639 = vmatpush3.bf16.msra.mxu1 %v650_v5  ;;  %v681_v30 = vld [vmem:[%s948_s0 + $0x30] ss:$8 sps:$4 sm:$0xff]   ;;  %v686_v31 = vld [vmem:[%s948_s0 + $0xa0] ss:$8 sps:$4 sm:$0xff]   ;;  %v684_v32 = vld [vmem:[%s948_s0 + $0x44] ss:$8 sps:$4 sm:$0xff]  }
   0xc   :  { %541 = vmatprep.subr.bf16.mxu0 %v651_v6  ;;  %632 = vmatprep.subr.bf16.mxu1 %v651_v6  ;;  %v688_v33 = vld [vmem:[%s948_s0 + $0xb4] ss:$8 sps:$4 sm:$0xff]   ;;  %v39_v34 = vld [vmem:[%s948_s0 + $0xc0] sm:$0xff]  ;;  %v692_v36 = vld [vmem:[%s948_s0 + $0xb0] ss:$8 sps:$4 sm:$0xff]  }
   0xd   :  { %v687_v35 = vld [vmem:[%s948_s0 + $0x40] ss:$8 sps:$4 sm:$0xff]   ;;  %v690_v37 = vld [vmem:[%s948_s0 + $0x54] ss:$8 sps:$4 sm:$0xff]   ;;  %v518_v38 = vcombine.high %v39_v34, %v39_v34  ;;  %v693_v39 = vld [vmem:[%s948_s0 + $0x50] ss:$8 sps:$4 sm:$0xff]   ;;  %v517_v40 = vcombine.low %v39_v34, %v39_v34 }
   0xe   :  { %v695_v41 = vld [vmem:[%s948_s0 + $0x64] ss:$8 sps:$4 sm:$0xff]   ;;  %v698_v42 = vld [vmem:[%s948_s0 + $0x60] ss:$8 sps:$4 sm:$0xff]  }
   0xf   :  { %542 = vmatpush3.bf16.msra.mxu0 %v652_v7  ;;  %640 = vmatpush3.bf16.msra.mxu1 %v652_v7  ;;  %v845_v45 = vld [vmem:[%s949_s2] ss:$0 sm:$0xff] }
  0x10   :  { %543 = vmatprep.subr.bf16.mxu0 %v653_v8  ;;  %633 = vmatprep.subr.bf16.mxu1 %v653_v8 }
  0x13   :  { %544 = vmatpush3.bf16.msra.mxu0 %v654_v9  ;;  %641 = vmatpush3.bf16.msra.mxu1 %v654_v9 }
  0x14   :  { %545 = vmatprep.subr.bf16.mxu0 %v655_v10  ;;  %634 = vmatprep.subr.bf16.mxu1 %v655_v10 }
  0x17   :  { %546 = vmatpush3.bf16.msra.mxu0 %v656_v13  ;;  %642 = vmatpush3.bf16.msra.mxu1 %v656_v13 }
  0x18   :  { %547 = vmatprep.subr.bf16.mxu0 %v657_v14  ;;  %635 = vmatprep.subr.bf16.mxu1 %v657_v14 }
  0x1b   :  { %548 = vmatpush3.bf16.msra.mxu0 %v658_v15  ;;  %643 = vmatpush3.bf16.msra.mxu1 %v658_v15 }
  0x1c   :  { %549 = vmatprep.subr.bf16.mxu0 %v659_v16  ;;  %636 = vmatprep.subr.bf16.mxu1 %v659_v16 }
  0x1f   :  { %550 = vmatpush3.bf16.msra.mxu0 %v660_v17  ;;  %644 = vmatpush3.bf16.msra.mxu1 %v660_v17 }
  0x22   :  { %335 = vmatmul.mubr.bf16.vlgmr.msra.gmra.mrb[0].mxu0 %v661_v18  ;;  %391 = vmatmul.mubr.bf16.vlgmr.msra.gmra.mrb[0].mxu1 %v664_v19 }
  0x23   :  { %342 = vmatprep.mubr.bf16.mxu0 %v667_v20  ;;  %398 = vmatprep.mubr.bf16.mxu1 %v670_v21 }
  0x2a   :  { %343 = vmatmul.mubr.bf16.gmra.mrb[4].mxu0 %v669_v22  ;;  %399 = vmatmul.mubr.bf16.gmra.mrb[4].mxu1 %v674_v23 }
  0x2b   :  { %350 = vmatprep.mubr.bf16.mxu0 %v672_v24  ;;  %406 = vmatprep.mubr.bf16.mxu1 %v676_v25 }
  0x32   :  { %351 = vmatmul.mubr.bf16.gmra.mrb[8].mxu0 %v675_v26  ;;  %407 = vmatmul.mubr.bf16.gmra.mrb[8].mxu1 %v680_v27 }
  0x33   :  { %358 = vmatprep.mubr.bf16.mxu0 %v678_v28  ;;  %414 = vmatprep.mubr.bf16.mxu1 %v682_v29 }
  0x3a   :  { %359 = vmatmul.mubr.bf16.gmra.mrb[12].mxu0 %v681_v30  ;;  %415 = vmatmul.mubr.bf16.gmra.mrb[12].mxu1 %v686_v31 }
  0x3b   :  { %366 = vmatprep.mubr.bf16.mxu0 %v684_v32  ;;  %422 = vmatprep.mubr.bf16.mxu1 %v688_v33 }
  0x42   :  { %367 = vmatmul.mubr.bf16.gmra.mrb[16].mxu0 %v687_v35  ;;  %423 = vmatmul.mubr.bf16.gmra.mrb[16].mxu1 %v692_v36 }
  0x43   :  { %374 = vmatprep.mubr.bf16.mxu0 %v690_v37  ;;  %430 = vmatprep.mubr.bf16.mxu1 %v518_v38 }
  0x4a   :  { %375 = vmatmul.mubr.bf16.gmra.mrb[20].mxu0 %v693_v39  ;;  %431 = vmatmul.mubr.bf16.gmra.mrb[20].mxu1 %v517_v40 }
  0x4b   :  { %382 = vmatprep.mubr.bf16.mxu0 %v695_v41 }
  0x52   :  { %383 = vmatmul.mubr.bf16.gmra.mrb[24].mxu0 %v698_v42 }
  0xf5   :  { %v551_v43 = vpop.f32.mrb[0].mxu0  ;;  %v593_v44 = vpop.f32.mrb[0].mxu1 }
  0xf6   :  { %v552_v46 = vpop.f32.mrb[1].mxu0  ;;  %v594_v47 = vpop.f32.mrb[1].mxu1 }
  0xf7   :  { %v553_v48 = vadd.f32 %v552_v46, %v551_v43  ;;  %v554_v49 = vpop.f32.mrb[2].mxu0  ;;  %v595_v50 = vadd.f32 %v594_v47, %v593_v44  ;;  %v596_v51 = vpop.f32.mrb[2].mxu1 }
  0xf8   :  { %v555_v52 = vpop.f32.mrb[3].mxu0  ;;  %v597_v53 = vpop.f32.mrb[3].mxu1 }
  0xf9   :  { %v337_v54 = vadd.f32 %v553_v48, %v845_v45  ;;  %v556_v55 = vadd.f32 %v555_v52, %v554_v49  ;;  %v393_v56 = vadd.f32 %v595_v50, %v845_v45  ;;  %v598_v57 = vadd.f32 %v597_v53, %v596_v51 }
  0xfb   :  { %v438_v58 = vmax.f32 %v337_v54, 0.0  ;;  %v340_v59 = vadd.f32 %v556_v55, %v845_v45  ;;  %v452_v60 = vmax.f32 %v393_v56, 0.0  ;;  %v396_v61 = vadd.f32 %v598_v57, %v845_v45 }
  0xfd   :  { %463 = vst [vmem:[%s950_s3] sm:$0xff] %v438_v58  ;;  %v439_v62 = vmax.f32 %v340_v59, 0.0  ;;  %v557_v63 = vpop.f32.mrb[4].mxu0  ;;  %477 = vst [vmem:[%s950_s3 + $0x70] sm:$0xff] %v452_v60  ;;  %v453_v0 = vmax.f32 %v396_v61, 0.0  ;;  %v599_v1 = vpop.f32.mrb[4].mxu1 }
  0xfe   :  { %v558_v2 = vpop.f32.mrb[5].mxu0  ;;  %v600_v3 = vpop.f32.mrb[5].mxu1 }
  0xff   :  { %464 = vst [vmem:[%s950_s3 + $0x8] sm:$0xff] %v439_v62  ;;  %v559_v4 = vadd.f32 %v558_v2, %v557_v63  ;;  %v560_v5 = vpop.f32.mrb[6].mxu0  ;;  %478 = vst [vmem:[%s950_s3 + $0x78] sm:$0xff] %v453_v0  ;;  %v601_v6 = vadd.f32 %v600_v3, %v599_v1  ;;  %v602_v7 = vpop.f32.mrb[6].mxu1 }
 0x100   :  { %v561_v8 = vpop.f32.mrb[7].mxu0  ;;  %v603_v9 = vpop.f32.mrb[7].mxu1 }
 0x101   :  { %v345_v10 = vadd.f32 %v559_v4, %v845_v45  ;;  %v562_v11 = vadd.f32 %v561_v8, %v560_v5  ;;  %v401_v12 = vadd.f32 %v601_v6, %v845_v45  ;;  %v604_v13 = vadd.f32 %v603_v9, %v602_v7 }
 0x103   :  { %v440_v14 = vmax.f32 %v345_v10, 0.0  ;;  %v348_v15 = vadd.f32 %v562_v11, %v845_v45  ;;  %v454_v16 = vmax.f32 %v401_v12, 0.0  ;;  %v404_v17 = vadd.f32 %v604_v13, %v845_v45 }
 0x105   :  { %465 = vst [vmem:[%s950_s3 + $0x10] sm:$0xff] %v440_v14  ;;  %v441_v18 = vmax.f32 %v348_v15, 0.0  ;;  %v563_v19 = vpop.f32.mrb[8].mxu0  ;;  %479 = vst [vmem:[%s950_s3 + $0x80] sm:$0xff] %v454_v16  ;;  %v455_v20 = vmax.f32 %v404_v17, 0.0  ;;  %v605_v21 = vpop.f32.mrb[8].mxu1 }
 0x106   :  { %v564_v22 = vpop.f32.mrb[9].mxu0  ;;  %v606_v23 = vpop.f32.mrb[9].mxu1 }
 0x107   :  { %466 = vst [vmem:[%s950_s3 + $0x18] sm:$0xff] %v441_v18  ;;  %v565_v24 = vadd.f32 %v564_v22, %v563_v19  ;;  %v566_v25 = vpop.f32.mrb[10].mxu0  ;;  %480 = vst [vmem:[%s950_s3 + $0x88] sm:$0xff] %v455_v20  ;;  %v607_v26 = vadd.f32 %v606_v23, %v605_v21  ;;  %v608_v27 = vpop.f32.mrb[10].mxu1 }
 0x108   :  { %v567_v28 = vpop.f32.mrb[11].mxu0  ;;  %v609_v29 = vpop.f32.mrb[11].mxu1 }
 0x109   :  { %v353_v30 = vadd.f32 %v565_v24, %v845_v45  ;;  %v568_v31 = vadd.f32 %v567_v28, %v566_v25  ;;  %v409_v32 = vadd.f32 %v607_v26, %v845_v45  ;;  %v610_v33 = vadd.f32 %v609_v29, %v608_v27 }
 0x10b   :  { %v442_v34 = vmax.f32 %v353_v30, 0.0  ;;  %v356_v35 = vadd.f32 %v568_v31, %v845_v45  ;;  %v456_v36 = vmax.f32 %v409_v32, 0.0  ;;  %v412_v37 = vadd.f32 %v610_v33, %v845_v45 }
 0x10d   :  { %467 = vst [vmem:[%s950_s3 + $0x20] sm:$0xff] %v442_v34  ;;  %v443_v38 = vmax.f32 %v356_v35, 0.0  ;;  %v569_v39 = vpop.f32.mrb[12].mxu0  ;;  %481 = vst [vmem:[%s950_s3 + $0x90] sm:$0xff] %v456_v36  ;;  %v457_v40 = vmax.f32 %v412_v37, 0.0  ;;  %v611_v41 = vpop.f32.mrb[12].mxu1 }
 0x10e   :  { %v570_v42 = vpop.f32.mrb[13].mxu0  ;;  %v612_v43 = vpop.f32.mrb[13].mxu1 }
 0x10f   :  { %468 = vst [vmem:[%s950_s3 + $0x28] sm:$0xff] %v443_v38  ;;  %v571_v44 = vadd.f32 %v570_v42, %v569_v39  ;;  %v572_v46 = vpop.f32.mrb[14].mxu0  ;;  %482 = vst [vmem:[%s950_s3 + $0x98] sm:$0xff] %v457_v40  ;;  %v613_v47 = vadd.f32 %v612_v43, %v611_v41  ;;  %v614_v48 = vpop.f32.mrb[14].mxu1 }
 0x110   :  { %v573_v49 = vpop.f32.mrb[15].mxu0  ;;  %v615_v50 = vpop.f32.mrb[15].mxu1 }
 0x111   :  { %v361_v51 = vadd.f32 %v571_v44, %v845_v45  ;;  %v574_v52 = vadd.f32 %v573_v49, %v572_v46  ;;  %v417_v53 = vadd.f32 %v613_v47, %v845_v45  ;;  %v616_v54 = vadd.f32 %v615_v50, %v614_v48 }
 0x113   :  { %v444_v55 = vmax.f32 %v361_v51, 0.0  ;;  %v364_v56 = vadd.f32 %v574_v52, %v845_v45  ;;  %v458_v57 = vmax.f32 %v417_v53, 0.0  ;;  %v420_v58 = vadd.f32 %v616_v54, %v845_v45 }
 0x115   :  { %469 = vst [vmem:[%s950_s3 + $0x30] sm:$0xff] %v444_v55  ;;  %v445_v59 = vmax.f32 %v364_v56, 0.0  ;;  %v575_v60 = vpop.f32.mrb[16].mxu0  ;;  %483 = vst [vmem:[%s950_s3 + $0xa0] sm:$0xff] %v458_v57  ;;  %v459_v61 = vmax.f32 %v420_v58, 0.0  ;;  %v617_v62 = vpop.f32.mrb[16].mxu1 }
 0x116   :  { %v576_v63 = vpop.f32.mrb[17].mxu0  ;;  %v618_v0 = vpop.f32.mrb[17].mxu1 }
 0x117   :  { %470 = vst [vmem:[%s950_s3 + $0x38] sm:$0xff] %v445_v59  ;;  %v577_v1 = vadd.f32 %v576_v63, %v575_v60  ;;  %v578_v2 = vpop.f32.mrb[18].mxu0  ;;  %484 = vst [vmem:[%s950_s3 + $0xa8] sm:$0xff] %v459_v61  ;;  %v619_v3 = vadd.f32 %v618_v0, %v617_v62  ;;  %v620_v4 = vpop.f32.mrb[18].mxu1 }
 0x118   :  { %v579_v5 = vpop.f32.mrb[19].mxu0  ;;  %v621_v6 = vpop.f32.mrb[19].mxu1 }
 0x119   :  { %v369_v7 = vadd.f32 %v577_v1, %v845_v45  ;;  %v580_v8 = vadd.f32 %v579_v5, %v578_v2  ;;  %v425_v9 = vadd.f32 %v619_v3, %v845_v45  ;;  %v622_v10 = vadd.f32 %v621_v6, %v620_v4 }
 0x11b   :  { %v446_v11 = vmax.f32 %v369_v7, 0.0  ;;  %v372_v12 = vadd.f32 %v580_v8, %v845_v45  ;;  %v460_v13 = vmax.f32 %v425_v9, 0.0  ;;  %v428_v14 = vadd.f32 %v622_v10, %v845_v45 }
 0x11d   :  { %471 = vst [vmem:[%s950_s3 + $0x40] sm:$0xff] %v446_v11  ;;  %v447_v15 = vmax.f32 %v372_v12, 0.0  ;;  %v581_v16 = vpop.f32.mrb[20].mxu0  ;;  %485 = vst [vmem:[%s950_s3 + $0xb0] sm:$0xff] %v460_v13  ;;  %v461_v17 = vmax.f32 %v428_v14, 0.0  ;;  %v623_v18 = vpop.f32.mrb[20].mxu1 }
 0x11e   :  { %v582_v19 = vpop.f32.mrb[21].mxu0  ;;  %v624_v20 = vpop.f32.mrb[21].mxu1 }
 0x11f   :  { %472 = vst [vmem:[%s950_s3 + $0x48] sm:$0xff] %v447_v15  ;;  %v583_v21 = vadd.f32 %v582_v19, %v581_v16  ;;  %v584_v22 = vpop.f32.mrb[22].mxu0  ;;  %486 = vst [vmem:[%s950_s3 + $0xb8] sm:$0xff] %v461_v17  ;;  %v625_v23 = vadd.f32 %v624_v20, %v623_v18  ;;  %v626_v24 = vpop.f32.mrb[22].mxu1 }
 0x120   :  { %v585_v25 = vpop.f32.mrb[23].mxu0  ;;  %v627_v26 = vpop.f32.mrb[23].mxu1 }
 0x121   :  { %v377_v27 = vadd.f32 %v583_v21, %v845_v45  ;;  %v586_v28 = vadd.f32 %v585_v25, %v584_v22  ;;  %v433_v29 = vadd.f32 %v625_v23, %v845_v45 }
 0x123   :  { %v448_v30 = vmax.f32 %v377_v27, 0.0  ;;  %v380_v31 = vadd.f32 %v586_v28, %v845_v45  ;;  %v462_v32 = vmax.f32 %v433_v29, 0.0 }
 0x125   :  { %473 = vst [vmem:[%s950_s3 + $0x50] sm:$0xff] %v448_v30  ;;  %v449_v33 = vmax.f32 %v380_v31, 0.0  ;;  %v587_v34 = vpop.f32.mrb[24].mxu0  ;;  %487 = vst [vmem:[%s950_s3 + $0xc0] sm:$0xff] %v462_v32 }
 0x126   :  { %v588_v35 = vpop.f32.mrb[25].mxu0 }
 0x127   :  { %474 = vst [vmem:[%s950_s3 + $0x58] sm:$0xff] %v449_v33  ;;  %v589_v36 = vadd.f32 %v588_v35, %v587_v34  ;;  %v590_v37 = vpop.f32.mrb[26].mxu0 }
 0x128   :  { %v591_v38 = vpop.f32.mrb[27].mxu0 }
 0x129   :  { %v385_v39 = vadd.f32 %v589_v36, %v845_v45  ;;  %v592_v40 = vadd.f32 %v591_v38, %v590_v37 }
 0x12b   :  { %v450_v41 = vmax.f32 %v385_v39, 0.0  ;;  %v388_v42 = vadd.f32 %v592_v40, %v845_v45 }
 0x12d   :  { %475 = vst [vmem:[%s950_s3 + $0x60] sm:$0xff] %v450_v41  ;;  %v451_v43 = vmax.f32 %v388_v42, 0.0 }
 0x12f   :  { %476 = vst [vmem:[%s950_s3 + $0x68] sm:$0xff] %v451_v43 }

// kernel: classifier_cnn_forward.8
= control target key start
LH: loop header
LB: loop body
LE: loop exit
PB: predicated region body
PF: predicated region fallthrough
CT: control target
= control target key end

     0   :  { %s207_s0 = inlined_call_operand.vmem [shape: f32[50,128], index: 0, kind: input, shape index: {}]   ;;  %s208_s1 = inlined_call_operand.vmem [shape: f32[50,128], index: 1, kind: input, shape index: {}]   ;;  %s209_s2 = inlined_call_operand.vmem [shape: f32[50,128], index: 2, kind: input, shape index: {}]   ;;  %s210_s3 = inlined_call_operand.vmem [shape: f32[50,128], index: 3, kind: input, shape index: {}]   ;;  %s211_s4 = inlined_call_operand.vmem [shape: f32[50,128], index: 4, kind: output, shape index: {}]  }
   0x1   :  { %v17_v0 = vld [vmem:[%s207_s0] sm:$0xff]  ;;  %v18_v5 = vld [vmem:[%s207_s0 + $0x8] sm:$0xff]  ;;  %v19_v11 = vld [vmem:[%s207_s0 + $0x10] sm:$0xff] }
   0x2   :  { %v24_v1 = vld [vmem:[%s208_s1] sm:$0xff]  ;;  %v25_v6 = vld [vmem:[%s208_s1 + $0x8] sm:$0xff]  ;;  %v26_v13 = vld [vmem:[%s208_s1 + $0x10] sm:$0xff] }
   0x3   :  { %v38_v2 = vld [vmem:[%s209_s2] sm:$0xff]  ;;  %v31_v3 = vmax.f32 %v17_v0, %v24_v1  ;;  %v32_v8 = vmax.f32 %v18_v5, %v25_v6  ;;  %v39_v9 = vld [vmem:[%s209_s2 + $0x8] sm:$0xff]  ;;  %v40_v14 = vld [vmem:[%s209_s2 + $0x10] sm:$0xff]  ;;  %v33_v17 = vmax.f32 %v19_v11, %v26_v13 }
   0x4   :  { %v45_v4 = vld [vmem:[%s210_s3] sm:$0xff]  ;;  %v46_v10 = vld [vmem:[%s210_s3 + $0x8] sm:$0xff]  ;;  %v47_v15 = vld [vmem:[%s210_s3 + $0x10] sm:$0xff] }
   0x5   :  { %v52_v7 = vmax.f32 %v38_v2, %v45_v4  ;;  %v53_v12 = vmax.f32 %v39_v9, %v46_v10  ;;  %v54_v18 = vmax.f32 %v40_v14, %v47_v15  ;;  %v20_v19 = vld [vmem:[%s207_s0 + $0x18] sm:$0xff]  ;;  %v21_v25 = vld [vmem:[%s207_s0 + $0x20] sm:$0xff]  ;;  %v22_v32 = vld [vmem:[%s207_s0 + $0x28] sm:$0xff] }
   0x6   :  { %v27_v20 = vld [vmem:[%s208_s1 + $0x18] sm:$0xff]  ;;  %v28_v26 = vld [vmem:[%s208_s1 + $0x20] sm:$0xff]  ;;  %v29_v34 = vld [vmem:[%s208_s1 + $0x28] sm:$0xff] }
   0x7   :  { %v59_v16 = vmax.f32 %v31_v3, %v52_v7  ;;  %v41_v21 = vld [vmem:[%s209_s2 + $0x18] sm:$0xff]  ;;  %v60_v22 = vmax.f32 %v32_v8, %v53_v12  ;;  %v34_v23 = vmax.f32 %v20_v19, %v27_v20  ;;  %v61_v27 = vmax.f32 %v33_v17, %v54_v18  ;;  %v42_v30 = vld [vmem:[%s209_s2 + $0x20] sm:$0xff]  ;;  %v43_v35 = vld [vmem:[%s209_s2 + $0x28] sm:$0xff] }
   0x8   :  { %v48_v24 = vld [vmem:[%s210_s3 + $0x18] sm:$0xff]  ;;  %v35_v29 = vmax.f32 %v21_v25, %v28_v26  ;;  %v49_v31 = vld [vmem:[%s210_s3 + $0x20] sm:$0xff]  ;;  %v50_v36 = vld [vmem:[%s210_s3 + $0x28] sm:$0xff]  ;;  %v36_v38 = vmax.f32 %v22_v32, %v29_v34 }
   0x9   :  { %66 = vst [vmem:[%s211_s4] sm:$0xff] %v59_v16  ;;  %v55_v28 = vmax.f32 %v41_v21, %v48_v24  ;;  %67 = vst [vmem:[%s211_s4 + $0x8] sm:$0xff] %v60_v22  ;;  %v56_v33 = vmax.f32 %v42_v30, %v49_v31  ;;  %v57_v39 = vmax.f32 %v43_v35, %v50_v36  ;;  %v23_v40 = vld [vmem:[%s207_s0 + $0x30] sm:$0x3] }
   0xa   :  { %68 = vst [vmem:[%s211_s4 + $0x10] sm:$0xff] %v61_v27  ;;  %v30_v41 = vld [vmem:[%s208_s1 + $0x30] sm:$0x3] }
   0xb   :  { %v62_v37 = vmax.f32 %v34_v23, %v55_v28  ;;  %v44_v42 = vld [vmem:[%s209_s2 + $0x30] sm:$0x3]  ;;  %v63_v43 = vmax.f32 %v35_v29, %v56_v33  ;;  %v37_v44 = vmax.f32 %v23_v40, %v30_v41  ;;  %v64_v46 = vmax.f32 %v36_v38, %v57_v39 }
   0xc   :  { %v51_v45 = vld [vmem:[%s210_s3 + $0x30] sm:$0x3] }
   0xd   :  { %69 = vst [vmem:[%s211_s4 + $0x18] sm:$0xff] %v62_v37  ;;  %v58_v47 = vmax.f32 %v44_v42, %v51_v45  ;;  %70 = vst [vmem:[%s211_s4 + $0x20] sm:$0xff] %v63_v43 }
   0xe   :  { %71 = vst [vmem:[%s211_s4 + $0x28] sm:$0xff] %v64_v46 }
   0xf   :  { %v65_v48 = vmax.f32 %v37_v44, %v58_v47 }
  0x11   :  { %72 = vst [vmem:[%s211_s4 + $0x30] sm:$0x3] %v65_v48 }

// kernel: classifier_cnn_forward.9
= control target key start
LH: loop header
LB: loop body
LE: loop exit
PB: predicated region body
PF: predicated region fallthrough
CT: control target
= control target key end

     0   :  { %v429_v1 = vmov 0.0   ;;  %vm430_vm0 = vmmov 0   ;;  %s554_s1 = inlined_call_operand.vmem [shape: bf16[256,128], index: 1, kind: input, shape index: {}]   ;;  %s555_s0 = inlined_call_operand.vmem [shape: bf16[8,256], index: 0, kind: input, shape index: {}]   ;;  %s556_s3 = inlined_call_operand.vmem [shape: bf16[128,128], index: 3, kind: input, shape index: {}]   ;;  %s557_s2 = inlined_call_operand.vmem [shape: f32[1,128], index: 2, kind: input, shape index: {}]   ;;  %s558_s4 = inlined_call_operand.vmem [shape: f32[1,128], index: 4, kind: input, shape index: {}]   ;;  %s559_s5 = inlined_call_operand.vmem [shape: f32[8,128], index: 5, kind: output, shape index: {}]  }
   0x1   :  { %v403_v0 = vld [vmem:[%s554_s1 + $0x40] sm:$0xff]   ;;  %381 = vmatprep.subr.bf16.mxu1 %v429_v1  ;;  %v405_v3 = vld [vmem:[%s554_s1 + $0x48] sm:$0xff]   ;;  %v407_v5 = vld [vmem:[%s554_s1 + $0x50] sm:$0xff]   ;;  %397 = vmatprep.mubr.msk.bf16.mxu1 %vm430_vm0, %v429_v1 }
   0x2   :  { %v404_v2 = vld [vmem:[%s554_s1] sm:$0xff]   ;;  %350 = vmatprep.subr.bf16.mxu0 %v403_v0  ;;  %v406_v4 = vld [vmem:[%s554_s1 + $0x8] sm:$0xff]   ;;  %v408_v6 = vld [vmem:[%s554_s1 + $0x10] sm:$0xff]  }
   0x3   :  { %351 = vmatpush3.bf16.msra.mxu0 %v404_v2  ;;  %v409_v7 = vld [vmem:[%s554_s1 + $0x58] sm:$0xff]   ;;  %v411_v9 = vld [vmem:[%s554_s1 + $0x60] sm:$0xff]   ;;  %v413_v11 = vld [vmem:[%s554_s1 + $0x68] sm:$0xff]  }
   0x4   :  { %352 = vmatprep.subr.bf16.mxu0 %v405_v3  ;;  %v410_v8 = vld [vmem:[%s554_s1 + $0x18] sm:$0xff]   ;;  %v412_v10 = vld [vmem:[%s554_s1 + $0x20] sm:$0xff]   ;;  %v414_v15 = vld [vmem:[%s554_s1 + $0x28] sm:$0xff]  }
   0x5   :  { %v21_v12 = vld [vmem:[%s555_s0] sm:$0xff]  ;;  %v415_v16 = vld [vmem:[%s554_s1 + $0x70] sm:$0xff]   ;;  %v422_v17 = vld [vmem:[%s556_s3 + $0x8] sm:$0xff]  }
   0x6   :  { %v324_v13 = vcombine.high %v21_v12, %v21_v12  ;;  %v421_v14 = vld [vmem:[%s556_s3] sm:$0xff]   ;;  %v416_v18 = vld [vmem:[%s554_s1 + $0x30] sm:$0xff]   ;;  %v417_v19 = vld [vmem:[%s554_s1 + $0x78] sm:$0xff]   ;;  %v323_v23 = vcombine.low %v21_v12, %v21_v12 }
   0x7   :  { %353 = vmatpush3.bf16.msra.mxu0 %v406_v4  ;;  %382 = vmatpush3.bf16.msra.mxu1 %v421_v14  ;;  %v423_v20 = vld [vmem:[%s556_s3 + $0x10] sm:$0xff]   ;;  %v418_v21 = vld [vmem:[%s554_s1 + $0x38] sm:$0xff]   ;;  %v425_v24 = vld [vmem:[%s556_s3 + $0x20] sm:$0xff]  }
   0x8   :  { %354 = vmatprep.subr.bf16.mxu0 %v407_v5  ;;  %196 = vmatprep.mubr.bf16.mxu0 %v324_v13  ;;  %v424_v22 = vld [vmem:[%s556_s3 + $0x18] sm:$0xff]   ;;  %v426_v25 = vld [vmem:[%s556_s3 + $0x28] sm:$0xff]   ;;  %v427_v26 = vld [vmem:[%s556_s3 + $0x30] sm:$0xff]  }
   0x9   :  { %383 = vmatprep.subr.bf16.mxu1 %v429_v1  ;;  %v428_v27 = vld [vmem:[%s556_s3 + $0x38] sm:$0xff]   ;;  %v322_v29 = vld [vmem:[%s557_s2] ss:$0 sm:$0xff] }
   0xa   :  { %v341_v37 = vld [vmem:[%s558_s4] ss:$0 sm:$0xff] }
   0xb   :  { %355 = vmatpush3.bf16.msra.mxu0 %v408_v6  ;;  %384 = vmatpush3.bf16.msra.mxu1 %v422_v17 }
   0xc   :  { %356 = vmatprep.subr.bf16.mxu0 %v409_v7  ;;  %385 = vmatprep.subr.bf16.mxu1 %v429_v1 }
   0xf   :  { %357 = vmatpush3.bf16.msra.mxu0 %v410_v8  ;;  %386 = vmatpush3.bf16.msra.mxu1 %v423_v20 }
  0x10   :  { %358 = vmatprep.subr.bf16.mxu0 %v411_v9  ;;  %387 = vmatprep.subr.bf16.mxu1 %v429_v1 }
  0x13   :  { %359 = vmatpush3.bf16.msra.mxu0 %v412_v10  ;;  %388 = vmatpush3.bf16.msra.mxu1 %v424_v22 }
  0x14   :  { %360 = vmatprep.subr.bf16.mxu0 %v413_v11  ;;  %389 = vmatprep.subr.bf16.mxu1 %v429_v1 }
  0x17   :  { %361 = vmatpush3.bf16.msra.mxu0 %v414_v15  ;;  %390 = vmatpush3.bf16.msra.mxu1 %v425_v24 }
  0x18   :  { %362 = vmatprep.subr.bf16.mxu0 %v415_v16  ;;  %391 = vmatprep.subr.bf16.mxu1 %v429_v1 }
  0x1b   :  { %363 = vmatpush3.bf16.msra.mxu0 %v416_v18  ;;  %392 = vmatpush3.bf16.msra.mxu1 %v426_v25 }
  0x1c   :  { %364 = vmatprep.subr.bf16.mxu0 %v417_v19  ;;  %393 = vmatprep.subr.bf16.mxu1 %v429_v1 }
  0x1f   :  { %365 = vmatpush3.bf16.msra.mxu0 %v418_v21  ;;  %394 = vmatpush3.bf16.msra.mxu1 %v427_v26 }
  0x20   :  { %395 = vmatprep.subr.bf16.mxu1 %v429_v1 }
  0x22   :  { %197 = vmatmul.mubr.bf16.vlgmr.msra.gmra.mrb[0].mxu0 %v323_v23 }
  0x23   :  { %396 = vmatpush3.bf16.msra.mxu1 %v428_v27 }
  0xf5   :  { %v366_v28 = vpop.f32.mrb[0].mxu0 }
  0xf6   :  { %v367_v30 = vpop.f32.mrb[1].mxu0 }
  0xf7   :  { %v368_v31 = vadd.f32 %v367_v30, %v366_v28  ;;  %v369_v32 = vpop.f32.mrb[2].mxu0 }
  0xf8   :  { %v370_v33 = vpop.f32.mrb[3].mxu0 }
  0xf9   :  { %v199_v34 = vadd.f32 %v368_v31, %v322_v29 }
  0xfb   :  { %v204_v35 = vmax.f32 %v199_v34, 0.0 }
  0xfd   :  { %v205_v36 = vpack.c.bf16 %v204_v35, %v204_v35 }
  0xff   :  { %398 = vmatmul.mubr.bf16.vlgmr.msra.gmra.mrb[0].mxu1 %v205_v36 }
 0x1d2   :  { %v311_v38 = vpop.f32.mrb[0].mxu1 }
 0x1d3   :  { %v312_v39 = vadd.f32 %v341_v37, %v311_v38  ;;  %v399_v40 = vpop.f32.mrb[1].mxu1 }
 0x1d4   :  { %v314_v41 = vpop.f32.mrb[2].mxu1 }
 0x1d5   :  { %317 = vst [vmem:[%s559_s5] sm:$0xff] %v312_v39  ;;  %v400_v42 = vpop.f32.mrb[3].mxu1 }

</bundles_post_ra>
